<compile_context>
chip_gen: v7x
topology: tpu7x:2x2x1
jax: 0.10.0
libtpu: 0.0.40
codegen_flags: <defaults>
</compile_context>

<pallas_src>
import functools

import numpy as np
import jax
import jax.numpy as jnp
from jax.experimental import pallas as pl
from jax.experimental.pallas import tpu as pltpu

LN_EPS = 1e-5  # PyTorch nn.LayerNorm default eps


def _round_up(x, m):
    return (x + m - 1) // m * m


def _output_block_kernel(xw_ref, xin_ref, wconv_ref, bconv_ref, gamma_ref,
                         beta_ref, w1_ref, b1_ref, w2_ref, b2_ref, o_ref, *,
                         nc0):
    """Fused causal-conv -> GLU(+residual) -> LayerNorm -> fc1 -> ReLU -> fc2.

    All refs are 2D and lane-dense in the (row, node*channel) layout:
      xw_ref   : (TM, N*Kt*c_in)      temporal windows (node-major, (k,c)-minor)
      xin_ref  : (TM, N*c0)           aligned (zero-padded) residual
      wconv_ref: (N*Kt*c_in, 2*N*c0)  block-diag conv weight, [p-half | q-half]
      w1_ref   : (N*c0, N*c1), w2_ref: (N*c1, N*end)  block-diag fc weights
      o_ref    : (TM, N*end)
    """
    # Causal conv (Kt,1): all Kt taps fused into one MXU matmul.
    conv = jnp.dot(xw_ref[...], wconv_ref[...],
                   preferred_element_type=jnp.float32) + bconv_ref[...]

    # GLU: (x_p + aligned residual) * sigmoid(x_q).  The split at lane nc0
    # (a multiple of 128) is a vreg-boundary slice; sigmoid runs on the EUP.
    gated = (conv[:, :nc0] + xin_ref[...]) * jax.nn.sigmoid(conv[:, nc0:])

    # LayerNorm over [node_num, channels[0]] == the whole lane dimension:
    # a plain last-axis reduction, no reshapes / relayouts.
    mean = jnp.mean(gated, axis=-1, keepdims=True)
    cent = gated - mean
    var = jnp.mean(cent * cent, axis=-1, keepdims=True)
    norm = cent * jax.lax.rsqrt(var + LN_EPS) * gamma_ref[...] + beta_ref[...]

    # fc1 + ReLU + fc2 (block-diagonal per-node weights, one matmul each).
    h = jnp.maximum(
        jnp.dot(norm, w1_ref[...], preferred_element_type=jnp.float32)
        + b1_ref[...], 0.0)
    out = jnp.dot(h, w2_ref[...], preferred_element_type=jnp.float32) + b2_ref[...]

    # Lane-dense, unmasked store: last dim is N*end (a multiple of 128 here).
    o_ref[...] = out.astype(o_ref.dtype)


def _block_diag_tile(block, n):
    """(K, C) -> (n*K, n*C) block-diagonal matrix with n copies of `block`."""
    K, C = block.shape
    eye = jnp.eye(n, dtype=block.dtype)
    return (eye[:, None, :, None] * block[None, :, None, :]).reshape(n * K, n * C)


def prepare_output_block_params(params, Kt, node_num):
    """Pre-packs the static OutputBlock weights into the lane-dense
    block-diagonal layout used by the kernel.  Done once per model."""
    wconv, bconv, gamma, beta, w1, b1, w2, b2 = params
    c_in = wconv.shape[1]
    c0 = gamma.shape[1]
    c1 = w1.shape[1]
    end = w2.shape[1]
    N = node_num

    wf = wconv.reshape(Kt * c_in, 2 * c0)            # (K, 2*c0), K = Kt*c_in
    wconv_bd = jnp.concatenate(
        [_block_diag_tile(wf[:, :c0], N),            # p-half  -> lanes [0, N*c0)
         _block_diag_tile(wf[:, c0:], N)], axis=1)   # q-half  -> lanes [N*c0, 2*N*c0)
    bconv_w = jnp.concatenate(
        [jnp.tile(bconv[:c0], N), jnp.tile(bconv[c0:], N)])[None, :]
    gamma_w = gamma.reshape(1, N * c0)
    beta_w = beta.reshape(1, N * c0)
    w1_bd = _block_diag_tile(w1, N)                  # (N*c0, N*c1)
    b1_w = jnp.tile(b1, N)[None, :]
    w2_bd = _block_diag_tile(w2, N)                  # (N*c1, N*end)
    b2_w = jnp.tile(b2, N)[None, :]

    kparams = (wconv_bd, bconv_w, gamma_w, beta_w, w1_bd, b1_w, w2_bd, b2_w)
    dims = (c_in, c0, c1, end)
    return kparams, dims


def output_block_pallas(x_nchw, kparams, dims, Kt):
    """x_nchw: (B, c_in, T, N) float32.  Returns (B, end_channel, T-Kt+1, N)."""
    c_in, c0, c1, end = dims
    B, ci, T, N = x_nchw.shape
    Tp = T - Kt + 1
    assert ci == c_in and c_in <= c0
    # TODO(synk): Align path for c_in > c_out (1x1 conv) not needed for this config.

    # --- wrapper-side layout prep (cheap XLA ops on tiny arrays) ---
    x = jnp.transpose(x_nchw, (0, 2, 3, 1))                       # (B, T, N, c_in)
    # temporal windows for the fused conv matmul: lane order (n-major, (k,c)-minor)
    xw = jnp.concatenate([x[:, k:k + Tp] for k in range(Kt)], axis=-1)
    xw_wide = xw.reshape(B * Tp, N * Kt * c_in)                   # (BT, N*Kt*c_in)
    # aligned residual (zero-padded channels == Align for c_in < c_out)
    x_in = jnp.pad(x[:, Kt - 1:], ((0, 0), (0, 0), (0, 0), (0, c0 - c_in)))
    xin_wide = x_in.reshape(B * Tp, N * c0)                       # (BT, N*c0)

    BT = B * Tp
    NK, NC0, NC1, NEND = N * Kt * c_in, N * c0, N * c1, N * end

    # Row tiling: 8-aligned tile, pad the row count so the grid divides evenly.
    TM = min(256, _round_up(BT, 8))
    BT_pad = _round_up(BT, TM)
    if BT_pad != BT:
        xw_wide = jnp.pad(xw_wide, ((0, BT_pad - BT), (0, 0)))
        xin_wide = jnp.pad(xin_wide, ((0, BT_pad - BT), (0, 0)))
    grid = (BT_pad // TM,)

    row_spec = lambda w: pl.BlockSpec((TM, w), lambda i: (i, 0))
    # Weights / biases use a constant index_map -> resident in VMEM across steps.
    full_spec = lambda r, w: pl.BlockSpec((r, w), lambda i: (0, 0))

    kernel = functools.partial(_output_block_kernel, nc0=NC0)
    out = pl.pallas_call(
        kernel,
        out_shape=jax.ShapeDtypeStruct((BT_pad, NEND), jnp.float32),
        grid=grid,
        in_specs=[
            row_spec(NK),                 # xw
            row_spec(NC0),                # xin
            full_spec(NK, 2 * NC0),       # wconv
            full_spec(1, 2 * NC0),        # bconv
            full_spec(1, NC0),            # gamma
            full_spec(1, NC0),            # beta
            full_spec(NC0, NC1),          # w1
            full_spec(1, NC1),            # b1
            full_spec(NC1, NEND),         # w2
            full_spec(1, NEND),           # b2
        ],
        out_specs=row_spec(NEND),
        compiler_params=pltpu.CompilerParams(
            dimension_semantics=("parallel",)),
    )(xw_wide, xin_wide, *kparams)

    out = out[:BT].reshape(B, Tp, N, end)
    return jnp.transpose(out, (0, 3, 1, 2))                       # (B, end, Tp, N)


def reference(x_nchw, params, Kt, c_in, c0):
    """Pure-JAX mirror of OutputBlock.forward (PyTorch semantics)."""
    wconv, bconv, gamma, beta, w1, b1, w2, b2 = params
    B, _, T, N = x_nchw.shape
    Tp = T - Kt + 1
    x = jnp.transpose(x_nchw, (0, 2, 3, 1))                       # (B, T, N, c_in)
    conv = sum(jnp.einsum('btnc,co->btno', x[:, k:k + Tp], wconv[k])
               for k in range(Kt)) + bconv
    x_p = conv[..., :c0]
    x_q = conv[..., c0:]
    x_in = jnp.concatenate(
        [x[:, Kt - 1:], jnp.zeros((B, Tp, N, c0 - c_in), x.dtype)], axis=-1)
    g = (x_p + x_in) * jax.nn.sigmoid(x_q)
    flat = g.reshape(B, Tp, N * c0)
    mean = flat.mean(-1, keepdims=True)
    var = ((flat - mean) ** 2).mean(-1, keepdims=True)
    norm = ((flat - mean) / jnp.sqrt(var + LN_EPS)).reshape(B, Tp, N, c0)
    norm = norm * gamma + beta
    h = jnp.maximum(norm @ w1 + b1, 0.0)
    out = h @ w2 + b2                                             # (B, Tp, N, end)
    return jnp.transpose(out, (0, 3, 1, 2))


if __name__ == "__main__":
    # OutputBlock(Ko=3, last_block_channel=4, channels=[32, 32],
    #             end_channel=8, node_num=16, dropout=0.0)
    B, c_in, T, N = 2, 4, 8, 16
    Ko = 3
    c0, c1 = 32, 32
    end_channel = 8

    ks = jax.random.split(jax.random.PRNGKey(0), 9)
    x = jax.random.normal(ks[0], (B, c_in, T, N), jnp.float32)
    # CausalConv2d weight (2c0, c_in, Ko, 1) stored here as (Ko, c_in, 2c0):
    wconv = 0.1 * jax.random.normal(ks[1], (Ko, c_in, 2 * c0), jnp.float32)
    bconv = 0.1 * jax.random.normal(ks[2], (2 * c0,), jnp.float32)
    gamma = 1.0 + 0.1 * jax.random.normal(ks[3], (N, c0), jnp.float32)
    beta = 0.1 * jax.random.normal(ks[4], (N, c0), jnp.float32)
    # nn.Linear weights stored transposed (in_features, out_features):
    w1 = 0.1 * jax.random.normal(ks[5], (c0, c1), jnp.float32)
    b1 = 0.1 * jax.random.normal(ks[6], (c1,), jnp.float32)
    w2 = 0.1 * jax.random.normal(ks[7], (c1, end_channel), jnp.float32)
    b2 = 0.1 * jax.random.normal(ks[8], (end_channel,), jnp.float32)

    params = (wconv, bconv, gamma, beta, w1, b1, w2, b2)
    kparams, dims = prepare_output_block_params(params, Ko, N)

    out = output_block_pallas(x, kparams, dims, Ko)
    out = jax.block_until_ready(out)

    ref = reference(x, params, Ko, c_in, c0)
    np.testing.assert_allclose(np.asarray(out), np.asarray(ref),
                               rtol=2e-5, atol=2e-5)
    assert out.shape == (B, end_channel, T - Ko + 1, N)
    print("KERNEL_OK")
</pallas_src>

<mosaic_0001>
module attributes {stable_mosaic.version = 11 : i64} {
  func.func @_output_block_kernel(%arg0: i32, %arg1: memref<16x192xf32, #tpu.memory_space<vmem>>, %arg2: memref<16x512xf32, #tpu.memory_space<vmem>>, %arg3: memref<192x1024xf32, #tpu.memory_space<vmem>>, %arg4: memref<1x1024xf32, #tpu.memory_space<vmem>>, %arg5: memref<1x512xf32, #tpu.memory_space<vmem>>, %arg6: memref<1x512xf32, #tpu.memory_space<vmem>>, %arg7: memref<512x512xf32, #tpu.memory_space<vmem>>, %arg8: memref<1x512xf32, #tpu.memory_space<vmem>>, %arg9: memref<512x128xf32, #tpu.memory_space<vmem>>, %arg10: memref<1x128xf32, #tpu.memory_space<vmem>>, %arg11: memref<16x128xf32, #tpu.memory_space<vmem>>) attributes {dimension_semantics = [#tpu.dimension_semantics<parallel>], iteration_bounds = array<i64: 1>, scalar_prefetch = 0 : i64, scratch_operands = 0 : i64, tpu.core_type = #tpu.core_type<tc>, window_params = [{transform_indices = @transform_0, window_bounds = array<i64: 16, 192>}, {transform_indices = @transform_1, window_bounds = array<i64: 16, 512>}, {pipeline_mode = #tpu.pipeline_mode<synchronous>, transform_indices = @transform_2, window_bounds = array<i64: 192, 1024>}, {pipeline_mode = #tpu.pipeline_mode<synchronous>, transform_indices = @transform_3, window_bounds = array<i64: 1, 1024>}, {pipeline_mode = #tpu.pipeline_mode<synchronous>, transform_indices = @transform_4, window_bounds = array<i64: 1, 512>}, {pipeline_mode = #tpu.pipeline_mode<synchronous>, transform_indices = @transform_5, window_bounds = array<i64: 1, 512>}, {pipeline_mode = #tpu.pipeline_mode<synchronous>, transform_indices = @transform_6, window_bounds = array<i64: 512, 512>}, {pipeline_mode = #tpu.pipeline_mode<synchronous>, transform_indices = @transform_7, window_bounds = array<i64: 1, 512>}, {pipeline_mode = #tpu.pipeline_mode<synchronous>, transform_indices = @transform_8, window_bounds = array<i64: 512, 128>}, {pipeline_mode = #tpu.pipeline_mode<synchronous>, transform_indices = @transform_9, window_bounds = array<i64: 1, 128>}, {transform_indices = @transform_10, window_bounds = array<i64: 16, 128>}]} {
    %c0 = arith.constant 0 : index
    %c0_0 = arith.constant 0 : index
    %0 = vector.load %arg1[%c0, %c0_0] : memref<16x192xf32, #tpu.memory_space<vmem>>, vector<16x192xf32>
    %c0_1 = arith.constant 0 : index
    %c0_2 = arith.constant 0 : index
    %1 = vector.load %arg3[%c0_1, %c0_2] : memref<192x1024xf32, #tpu.memory_space<vmem>>, vector<192x1024xf32>
    %cst = arith.constant dense<0.000000e+00> : vector<16x1024xf32>
    %2 = tpu.matmul %0, %1, %cst {dimension_numbers = #tpu.dot_dimension_numbers<[1], [0], [0], [1], [0, 0, 1, 1], [], []>} : vector<16x192xf32>, vector<192x1024xf32>, vector<16x1024xf32> -> vector<16x1024xf32>
    %c0_3 = arith.constant 0 : index
    %c0_4 = arith.constant 0 : index
    %3 = vector.load %arg4[%c0_3, %c0_4] : memref<1x1024xf32, #tpu.memory_space<vmem>>, vector<1x1024xf32>
    %4 = vector.broadcast %3 : vector<1x1024xf32> to vector<16x1024xf32>
    %5 = arith.addf %2, %4 : vector<16x1024xf32>
    %6 = vector.extract_strided_slice %5 {offsets = [0, 0], sizes = [16, 512], strides = [1, 1]} : vector<16x1024xf32> to vector<16x512xf32>
    %c0_5 = arith.constant 0 : index
    %c0_6 = arith.constant 0 : index
    %7 = vector.load %arg2[%c0_5, %c0_6] : memref<16x512xf32, #tpu.memory_space<vmem>>, vector<16x512xf32>
    %8 = arith.addf %6, %7 : vector<16x512xf32>
    %9 = vector.extract_strided_slice %5 {offsets = [0, 512], sizes = [16, 512], strides = [1, 1]} : vector<16x1024xf32> to vector<16x512xf32>
    %10 = arith.negf %9 : vector<16x512xf32>
    %11 = math.exp %10 : vector<16x512xf32>
    %cst_7 = arith.constant 1.000000e+00 : f32
    %12 = vector.broadcast %cst_7 : f32 to vector<16x512xf32>
    %13 = arith.addf %12, %11 : vector<16x512xf32>
    %14 = arith.divf %12, %13 : vector<16x512xf32>
    %15 = arith.mulf %8, %14 : vector<16x512xf32>
    %cst_8 = arith.constant dense<0.000000e+00> : vector<16xf32>
    %16 = vector.multi_reduction <add>, %15, %cst_8 [1] : vector<16x512xf32> to vector<16xf32>
    %17 = vector.shape_cast %16 : vector<16xf32> to vector<16x1xf32>
    %cst_9 = arith.constant 5.120000e+02 : f32
    %18 = vector.broadcast %cst_9 : f32 to vector<16x1xf32>
    %19 = arith.divf %17, %18 : vector<16x1xf32>
    %20 = vector.broadcast %19 : vector<16x1xf32> to vector<16x512xf32>
    %21 = arith.subf %15, %20 : vector<16x512xf32>
    %22 = arith.mulf %21, %21 : vector<16x512xf32>
    %cst_10 = arith.constant dense<0.000000e+00> : vector<16xf32>
    %23 = vector.multi_reduction <add>, %22, %cst_10 [1] : vector<16x512xf32> to vector<16xf32>
    %24 = vector.shape_cast %23 : vector<16xf32> to vector<16x1xf32>
    %cst_11 = arith.constant 5.120000e+02 : f32
    %25 = vector.broadcast %cst_11 : f32 to vector<16x1xf32>
    %26 = arith.divf %24, %25 : vector<16x1xf32>
    %cst_12 = arith.constant 9.99999974E-6 : f32
    %27 = vector.broadcast %cst_12 : f32 to vector<16x1xf32>
    %28 = arith.addf %26, %27 : vector<16x1xf32>
    %29 = math.rsqrt %28 : vector<16x1xf32>
    %30 = vector.broadcast %29 : vector<16x1xf32> to vector<16x512xf32>
    %31 = arith.mulf %21, %30 : vector<16x512xf32>
    %c0_13 = arith.constant 0 : index
    %c0_14 = arith.constant 0 : index
    %32 = vector.load %arg5[%c0_13, %c0_14] : memref<1x512xf32, #tpu.memory_space<vmem>>, vector<1x512xf32>
    %33 = vector.broadcast %32 : vector<1x512xf32> to vector<16x512xf32>
    %34 = arith.mulf %31, %33 : vector<16x512xf32>
    %c0_15 = arith.constant 0 : index
    %c0_16 = arith.constant 0 : index
    %35 = vector.load %arg6[%c0_15, %c0_16] : memref<1x512xf32, #tpu.memory_space<vmem>>, vector<1x512xf32>
    %36 = vector.broadcast %35 : vector<1x512xf32> to vector<16x512xf32>
    %37 = arith.addf %34, %36 : vector<16x512xf32>
    %c0_17 = arith.constant 0 : index
    %c0_18 = arith.constant 0 : index
    %38 = vector.load %arg7[%c0_17, %c0_18] : memref<512x512xf32, #tpu.memory_space<vmem>>, vector<512x512xf32>
    %cst_19 = arith.constant dense<0.000000e+00> : vector<16x512xf32>
    %39 = tpu.matmul %37, %38, %cst_19 {dimension_numbers = #tpu.dot_dimension_numbers<[1], [0], [0], [1], [0, 0, 1, 1], [], []>} : vector<16x512xf32>, vector<512x512xf32>, vector<16x512xf32> -> vector<16x512xf32>
    %c0_20 = arith.constant 0 : index
    %c0_21 = arith.constant 0 : index
    %40 = vector.load %arg8[%c0_20, %c0_21] : memref<1x512xf32, #tpu.memory_space<vmem>>, vector<1x512xf32>
    %41 = vector.broadcast %40 : vector<1x512xf32> to vector<16x512xf32>
    %42 = arith.addf %39, %41 : vector<16x512xf32>
    %cst_22 = arith.constant 0.000000e+00 : f32
    %43 = vector.broadcast %cst_22 : f32 to vector<16x512xf32>
    %44 = arith.maximumf %42, %43 : vector<16x512xf32>
    %c0_23 = arith.constant 0 : index
    %c0_24 = arith.constant 0 : index
    %45 = vector.load %arg9[%c0_23, %c0_24] : memref<512x128xf32, #tpu.memory_space<vmem>>, vector<512x128xf32>
    %cst_25 = arith.constant dense<0.000000e+00> : vector<16x128xf32>
    %46 = tpu.matmul %44, %45, %cst_25 {dimension_numbers = #tpu.dot_dimension_numbers<[1], [0], [0], [1], [0, 0, 1, 1], [], []>} : vector<16x512xf32>, vector<512x128xf32>, vector<16x128xf32> -> vector<16x128xf32>
    %c0_26 = arith.constant 0 : index
    %c0_27 = arith.constant 0 : index
    %47 = vector.load %arg10[%c0_26, %c0_27] : memref<1x128xf32, #tpu.memory_space<vmem>>, vector<1x128xf32>
    %48 = vector.broadcast %47 : vector<1x128xf32> to vector<16x128xf32>
    %49 = arith.addf %46, %48 : vector<16x128xf32>
    %c0_28 = arith.constant 0 : index
    %c0_29 = arith.constant 0 : index
    %50 = vector.load %arg11[%c0_28, %c0_29] : memref<16x128xf32, #tpu.memory_space<vmem>>, vector<16x128xf32>
    tpu.vector_store %arg11[%c0_28, %c0_29], %49 {strides = array<i32>} : memref<16x128xf32, #tpu.memory_space<vmem>>, vector<16x128xf32>,
    return
  }
  func.func @transform_0(%arg0: i32) -> (i32, i32) {
    %c0_i32 = arith.constant 0 : i32
    %c0_i32_0 = arith.constant 0 : i32
    return %arg0, %c0_i32 : i32, i32
  }
  func.func @transform_1(%arg0: i32) -> (i32, i32) {
    %c0_i32 = arith.constant 0 : i32
    %c0_i32_0 = arith.constant 0 : i32
    return %arg0, %c0_i32 : i32, i32
  }
  func.func @transform_2(%arg0: i32) -> (i32, i32) {
    %c0_i32 = arith.constant 0 : i32
    %c0_i32_0 = arith.constant 0 : i32
    %c0_i32_1 = arith.constant 0 : i32
    return %c0_i32, %c0_i32_0 : i32, i32
  }
  func.func @transform_3(%arg0: i32) -> (i32, i32) {
    %c0_i32 = arith.constant 0 : i32
    %c0_i32_0 = arith.constant 0 : i32
    %c0_i32_1 = arith.constant 0 : i32
    return %c0_i32, %c0_i32_0 : i32, i32
  }
  func.func @transform_4(%arg0: i32) -> (i32, i32) {
    %c0_i32 = arith.constant 0 : i32
    %c0_i32_0 = arith.constant 0 : i32
    %c0_i32_1 = arith.constant 0 : i32
    return %c0_i32, %c0_i32_0 : i32, i32
  }
  func.func @transform_5(%arg0: i32) -> (i32, i32) {
    %c0_i32 = arith.constant 0 : i32
    %c0_i32_0 = arith.constant 0 : i32
    %c0_i32_1 = arith.constant 0 : i32
    return %c0_i32, %c0_i32_0 : i32, i32
  }
  func.func @transform_6(%arg0: i32) -> (i32, i32) {
    %c0_i32 = arith.constant 0 : i32
    %c0_i32_0 = arith.constant 0 : i32
    %c0_i32_1 = arith.constant 0 : i32
    return %c0_i32, %c0_i32_0 : i32, i32
  }
  func.func @transform_7(%arg0: i32) -> (i32, i32) {
    %c0_i32 = arith.constant 0 : i32
    %c0_i32_0 = arith.constant 0 : i32
    %c0_i32_1 = arith.constant 0 : i32
    return %c0_i32, %c0_i32_0 : i32, i32
  }
  func.func @transform_8(%arg0: i32) -> (i32, i32) {
    %c0_i32 = arith.constant 0 : i32
    %c0_i32_0 = arith.constant 0 : i32
    %c0_i32_1 = arith.constant 0 : i32
    return %c0_i32, %c0_i32_0 : i32, i32
  }
  func.func @transform_9(%arg0: i32) -> (i32, i32) {
    %c0_i32 = arith.constant 0 : i32
    %c0_i32_0 = arith.constant 0 : i32
    %c0_i32_1 = arith.constant 0 : i32
    return %c0_i32, %c0_i32_0 : i32, i32
  }
  func.func @transform_10(%arg0: i32) -> (i32, i32) {
    %c0_i32 = arith.constant 0 : i32
    %c0_i32_0 = arith.constant 0 : i32
    return %arg0, %c0_i32 : i32, i32
  }
}

</mosaic_0001>

<bundles_post_ra>
// kernel: tpu_custom_call.1
= control target key start
LH: loop header
LB: loop body
LE: loop exit
PB: predicated region body
PF: predicated region fallthrough
CT: control target
= control target key end

     0   :  { %15 = vsyncpa [#allocation3], 0  ;;  %s2825_s0 = inlined_call_operand.hbm [shape: f32[16,192], index: 0, kind: input, shape index: {}]   ;;  %s2826_s1 = inlined_call_operand.hbm [shape: f32[16,512], index: 1, kind: input, shape index: {}]   ;;  %s2827_s2 = inlined_call_operand.hbm [shape: f32[192,1024], index: 2, kind: input, shape index: {}]   ;;  %s2828_s3 = inlined_call_operand.vmem [shape: f32[1,1024], index: 3, kind: input, shape index: {}]   ;;  %s2829_s4 = inlined_call_operand.vmem [shape: f32[1,512], index: 4, kind: input, shape index: {}]   ;;  %s2830_s5 = inlined_call_operand.vmem [shape: f32[1,512], index: 5, kind: input, shape index: {}]   ;;  %s2831_s6 = inlined_call_operand.hbm [shape: f32[512,512], index: 6, kind: input, shape index: {}]   ;;  %s2832_s7 = inlined_call_operand.vmem [shape: f32[1,512], index: 7, kind: input, shape index: {}]   ;;  %s2833_s8 = inlined_call_operand.hbm [shape: f32[512,128], index: 8, kind: input, shape index: {}]   ;;  %s2834_s9 = inlined_call_operand.vmem [shape: f32[1,128], index: 9, kind: input, shape index: {}]   ;;  %s2835_s10 = inlined_call_operand.hbm [shape: f32[16,128], index: 10, kind: output, shape index: {}]  }
   0x1   :  { %16 = vsyncpa [#allocation6], 0 }
   0x2   :  { %17 = vsyncpa [#allocation9], 0 }
   0x3   :  { %18 = vsyncpa [#allocation4], 0  ;;  %s2489_s13 = smov [#allocation5]   ;;  %s2349_s17 = scalar_lea.hbm %s2826_s1, 1024 }
   0x4   :  { %s36_s14 = sshll.u32 %s2489_s13, 4  ;;  %p2350_p0 = scmp.ne.s32.totalorder %s2826_s1, %s2349_s17  ;;  %s37_s14 = int_to_ptr.vmem [resolvable:$true] %s36_s14 }
   0x5   :  { %p2353_p1 = scmp.lt.u32.totalorder %s2349_s17, %s2826_s1 }
   0x7   :  { %p2355_p2 = pnand %p2353_p1, %p2350_p0 }
   0x9   :  { %2358 = shalt.err (!%p2355_p2)
}
   0xa   :  { %s2359_s22 = scalar_lea.vmem %s37_s14, 1024  ;;  %p2364_p4 = scmp.lt.s32.totalorder %s37_s14, %s37_s14 }
   0xb   :  { %p2360_p3 = scmp.ne.s32.totalorder %s37_s14, %s2359_s22  ;;  %p2365_p5 = scmp.lt.s32.totalorder %s2359_s22, %s2359_s22 }
   0xd   :  { %p2366_p6 = por %p2365_p5, %p2364_p4 }
   0xf   :  { %p2367_p7 = pnand %p2366_p6, %p2360_p3 }
  0x11   :  { %2370 = shalt.err (!%p2367_p7)
}
  0x12   :  { %s2490_s23 = smov 512   ;;  %s2491_s24 = smov 32  }
  0x13   :  { %42 = dma.hbm_to_vmem [thread:$0]  %s2826_s1, 1024, %s37_s14, [#allocation6], %s2490_s23, %s2490_s23, %s2491_s24  }
  0x14   :  { %s2492_s27 = smov [#allocation8]   ;;  %s2493_s29 = smov [#allocation2]  }
  0x15   :  { %s66_s28 = sshll.u32 %s2492_s27, 4  ;;  %s24_s30 = sshll.u32 %s2493_s29, 4  ;;  %s67_s28 = int_to_ptr.vmem [resolvable:$true] %s66_s28  ;;  %s25_s30 = int_to_ptr.vmem [resolvable:$true] %s24_s30 }
  0x16   :  { %s2371_s13 = scalar_lea.hbm %s2831_s6, 32768 }
  0x17   :  { %p2372_p8 = scmp.ne.s32.totalorder %s2831_s6, %s2371_s13  ;;  %p2375_p9 = scmp.lt.u32.totalorder %s2371_s13, %s2831_s6 }
  0x19   :  { %p2377_p10 = pnand %p2375_p9, %p2372_p8 }
  0x1b   :  { %2380 = shalt.err (!%p2377_p10)
}
  0x1c   :  { %s2381_s1 = scalar_lea.vmem %s67_s28, 32768  ;;  %p2386_p12 = scmp.lt.s32.totalorder %s67_s28, %s67_s28 }
  0x1d   :  { %p2382_p11 = scmp.ne.s32.totalorder %s67_s28, %s2381_s1  ;;  %p2387_p13 = scmp.lt.s32.totalorder %s2381_s1, %s2381_s1 }
  0x1f   :  { %p2388_p0 = por %p2387_p13, %p2386_p12 }
  0x21   :  { %p2389_p1 = pnand %p2388_p0, %p2382_p11 }
  0x23   :  { %2392 = shalt.err (!%p2389_p1)
}
  0x24   :  { %72 = dma.hbm_to_vmem [thread:$0]  %s2831_s6, 32768, %s67_s28, [#allocation9], %s2490_s23, %s2490_s23, %s2491_s24  }
  0x25   :  { %s2393_s22 = scalar_lea.hbm %s2825_s0, 512 }
  0x26   :  { %p2394_p2 = scmp.ne.s32.totalorder %s2825_s0, %s2393_s22  ;;  %p2397_p3 = scmp.lt.u32.totalorder %s2393_s22, %s2825_s0 }
  0x28   :  { %p2399_p4 = pnand %p2397_p3, %p2394_p2 }
  0x2a   :  { %2402 = shalt.err (!%p2399_p4)
}
  0x2b   :  { %s2403_s11 = scalar_lea.vmem %s25_s30, 512  ;;  %p2408_p6 = scmp.lt.s32.totalorder %s25_s30, %s25_s30 }
  0x2c   :  { %p2404_p5 = scmp.ne.s32.totalorder %s25_s30, %s2403_s11  ;;  %p2409_p7 = scmp.lt.s32.totalorder %s2403_s11, %s2403_s11 }
  0x2e   :  { %p2410_p8 = por %p2409_p7, %p2408_p6 }
  0x30   :  { %p2411_p9 = pnand %p2410_p8, %p2404_p5 }
  0x32   :  { %2414 = shalt.err (!%p2411_p9)
}
  0x33   :  { %s2494_s6 = smov 256   ;;  %s2495_s23 = smov 16  }
  0x34   :  { %30 = dma.hbm_to_vmem [thread:$0]  %s2825_s0, 512, %s25_s30, [#allocation3], %s2494_s6, %s2494_s6, %s2495_s23  }
  0x35   :  { %s2496_s12 = smov [#allocation7]   ;;  %s2415_s17 = scalar_lea.hbm %s2827_s2, 24576 }
  0x36   :  { %s48_s13 = sshll.u32 %s2496_s12, 4  ;;  %p2416_p10 = scmp.ne.s32.totalorder %s2827_s2, %s2415_s17  ;;  %s49_s13 = int_to_ptr.vmem [resolvable:$true] %s48_s13 }
  0x37   :  { %p2419_p11 = scmp.lt.u32.totalorder %s2415_s17, %s2827_s2 }
  0x39   :  { %p2421_p12 = pnand %p2419_p11, %p2416_p10 }
  0x3b   :  { %2424 = shalt.err (!%p2421_p12)
}
  0x3c   :  { %s2425_s20 = scalar_lea.vmem %s49_s13, 24576  ;;  %p2430_p0 = scmp.lt.s32.totalorder %s49_s13, %s49_s13 }
  0x3d   :  { %p2426_p13 = scmp.ne.s32.totalorder %s49_s13, %s2425_s20  ;;  %p2431_p1 = scmp.lt.s32.totalorder %s2425_s20, %s2425_s20 }
  0x3f   :  { %p2432_p2 = por %p2431_p1, %p2430_p0 }
  0x41   :  { %p2433_p3 = pnand %p2432_p2, %p2426_p13 }
  0x43   :  { %2436 = shalt.err (!%p2433_p3)
}
  0x44   :  { %s2497_s0 = smov 1024   ;;  %s2498_s30 = smov 64  }
  0x45   :  { %54 = dma.hbm_to_vmem [thread:$0]  %s2827_s2, 24576, %s49_s13, [#allocation6], %s2497_s0, %s2497_s0, %s2498_s30  }
  0x46   :  { %s2499_s25 = smov [#allocation10]   ;;  %s2437_s11 = scalar_lea.hbm %s2833_s8, 8192 }
  0x47   :  { %s80_s26 = sshll.u32 %s2499_s25, 4  ;;  %p2438_p4 = scmp.ne.s32.totalorder %s2833_s8, %s2437_s11  ;;  %s81_s26 = int_to_ptr.vmem [resolvable:$true] %s80_s26 }
  0x48   :  { %p2441_p5 = scmp.lt.u32.totalorder %s2437_s11, %s2833_s8 }
  0x4a   :  { %p2443_p6 = pnand %p2441_p5, %p2438_p4 }
  0x4c   :  { %2446 = shalt.err (!%p2443_p6)
}
  0x4d   :  { %s2447_s12 = scalar_lea.vmem %s81_s26, 8192  ;;  %p2452_p8 = scmp.lt.s32.totalorder %s81_s26, %s81_s26 }
  0x4e   :  { %p2448_p7 = scmp.ne.s32.totalorder %s81_s26, %s2447_s12  ;;  %p2453_p9 = scmp.lt.s32.totalorder %s2447_s12, %s2447_s12 }
  0x50   :  { %p2454_p10 = por %p2453_p9, %p2452_p8 }
  0x52   :  { %p2455_p11 = pnand %p2454_p10, %p2448_p7 }
  0x54   :  { %2458 = shalt.err (!%p2455_p11)
}
  0x55   :  { %s2500_s2 = smov 128   ;;  %s2501_s13 = smov 8  }
  0x56   :  { %86 = dma.hbm_to_vmem [thread:$0]  %s2833_s8, 8192, %s81_s26, [#allocation9], %s2500_s2, %s2500_s2, %s2501_s13  }
  0x57   :  { %2481 = dma.done.wait [#allocation3], 512  }
  0x58   :  { %2482 = vsyncadd [#allocation3], 4294966784 }
  0x59   :  { %2483 = dma.done.wait [#allocation6], 25600  }
  0x5a   :  { %2484 = vsyncadd [#allocation6], 4294941696 }
  0x5b   :  { %2485 = dma.done.wait [#allocation9], 40960  }
  0x5c   :  { %2486 = vsyncadd [#allocation9], 4294926336  ;;  %v109_v0 = vld [vmem:[#allocation7 + $0x8] sm:$0xff]  ;;  %v111_v2 = vld [vmem:[#allocation7 + $0x18] sm:$0xff]  ;;  %vm342_vm0 = vcmask 523264   ;;  %s2502_s20 = smov [#allocation11]  }
  0x5d   :  { %v117_v1 = vld [vmem:[#allocation7 + $0x48] sm:$0xff]  ;;  %v119_v4 = vld [vmem:[#allocation7 + $0x58] sm:$0xff]  ;;  %v108_v5 = vld [vmem:[#allocation7] sm:$0xff]  ;;  %s1664_s0 = sshll.u32 %s2502_s20, 4  ;;  %s1665_s0 = int_to_ptr.vmem [resolvable:$true] %s1664_s0 }
  0x5e   :  { %v1771_v3 = vpack.c.bf16 %v117_v1, %v109_v0  ;;  %v116_v6 = vld [vmem:[#allocation7 + $0x40] sm:$0xff]  ;;  %v1819_v7 = vpack.c.bf16 %v119_v4, %v111_v2  ;;  %v110_v9 = vld [vmem:[#allocation7 + $0x10] sm:$0xff]  ;;  %v125_v11 = vld [vmem:[#allocation7 + $0x88] sm:$0xff]  ;;  %p2464_p13 = scmp.lt.s32.totalorder %s1665_s0, %s1665_s0 }
  0x5f   :  { %v1773_v8 = vpack.c.bf16 %v116_v6, %v108_v5  ;;  %v118_v10 = vld [vmem:[#allocation7 + $0x50] sm:$0xff]  ;;  %v133_v13 = vld [vmem:[#allocation7 + $0xc8] sm:$0xff]  ;;  %v127_v14 = vld [vmem:[#allocation7 + $0x98] sm:$0xff] }
  0x60   :  { %1772 = vmatprep.subr.bf16.mxu0 %v1771_v3  ;;  %v1821_v12 = vpack.c.bf16 %v118_v10, %v110_v9  ;;  %v135_v15 = vld [vmem:[#allocation7 + $0xd8] sm:$0xff]  ;;  %1820 = vmatprep.subr.bf16.mxu1 %v1819_v7  ;;  %v1775_v16 = vpack.c.bf16 %v133_v13, %v125_v11  ;;  %v124_v18 = vld [vmem:[#allocation7 + $0x80] sm:$0xff]  ;;  %v126_v20 = vld [vmem:[#allocation7 + $0x90] sm:$0xff] }
  0x61   :  { %1774 = vmatpush1.bf16.msra.mxu0 %v1773_v8  ;;  %v1823_v17 = vpack.c.bf16 %v135_v15, %v127_v14  ;;  %v132_v19 = vld [vmem:[#allocation7 + $0xc0] sm:$0xff]  ;;  %v134_v22 = vld [vmem:[#allocation7 + $0xd0] sm:$0xff]  ;;  %v141_v23 = vld [vmem:[#allocation7 + $0x108] sm:$0xff] }
  0x62   :  { %1822 = vmatpush1.bf16.msra.mxu1 %v1821_v12  ;;  %v1777_v21 = vpack.c.bf16 %v132_v19, %v124_v18  ;;  %v149_v24 = vld [vmem:[#allocation7 + $0x148] sm:$0xff]  ;;  %1776 = vmatprep.subr.bf16.mxu0 %v1775_v16  ;;  %v1825_v25 = vpack.c.bf16 %v134_v22, %v126_v20  ;;  %v143_v27 = vld [vmem:[#allocation7 + $0x118] sm:$0xff]  ;;  %v140_v29 = vld [vmem:[#allocation7 + $0x100] sm:$0xff] }
  0x63   :  { %1824 = vmatprep.subr.bf16.mxu1 %v1823_v17  ;;  %v1779_v26 = vpack.c.bf16 %v149_v24, %v141_v23  ;;  %v151_v28 = vld [vmem:[#allocation7 + $0x158] sm:$0xff]  ;;  %v148_v31 = vld [vmem:[#allocation7 + $0x140] sm:$0xff]  ;;  %v142_v32 = vld [vmem:[#allocation7 + $0x110] sm:$0xff] }
  0x64   :  { %v1827_v30 = vpack.c.bf16 %v151_v28, %v143_v27  ;;  %v150_v33 = vld [vmem:[#allocation7 + $0x150] sm:$0xff]  ;;  %v1781_v34 = vpack.c.bf16 %v148_v31, %v140_v29  ;;  %v157_v35 = vld [vmem:[#allocation7 + $0x188] sm:$0xff]  ;;  %v159_v37 = vld [vmem:[#allocation7 + $0x198] sm:$0xff] }
  0x65   :  { %1778 = vmatpush1.bf16.msra.mxu0 %v1777_v21  ;;  %v165_v36 = vld [vmem:[#allocation7 + $0x1c8] sm:$0xff]  ;;  %v1829_v38 = vpack.c.bf16 %v150_v33, %v142_v32  ;;  %v167_v40 = vld [vmem:[#allocation7 + $0x1d8] sm:$0xff]  ;;  %v156_v41 = vld [vmem:[#allocation7 + $0x180] sm:$0xff] }
  0x66   :  { %1826 = vmatpush1.bf16.msra.mxu1 %v1825_v25  ;;  %1780 = vmatprep.subr.bf16.mxu0 %v1779_v26  ;;  %v1783_v39 = vpack.c.bf16 %v165_v36, %v157_v35  ;;  %v164_v42 = vld [vmem:[#allocation7 + $0x1c0] sm:$0xff]  ;;  %v1831_v43 = vpack.c.bf16 %v167_v40, %v159_v37  ;;  %v158_v44 = vld [vmem:[#allocation7 + $0x190] sm:$0xff]  ;;  %v173_v46 = vld [vmem:[#allocation7 + $0x208] sm:$0xff] }
  0x67   :  { %1828 = vmatprep.subr.bf16.mxu1 %v1827_v30  ;;  %v166_v45 = vld [vmem:[#allocation7 + $0x1d0] sm:$0xff]  ;;  %v181_v47 = vld [vmem:[#allocation7 + $0x248] sm:$0xff]  ;;  %v175_v48 = vld [vmem:[#allocation7 + $0x218] sm:$0xff]  ;;  %v1785_v50 = vpack.c.bf16 %v164_v42, %v156_v41 }
  0x68   :  { %v183_v49 = vld [vmem:[#allocation7 + $0x258] sm:$0xff]  ;;  %v1833_v51 = vpack.c.bf16 %v166_v45, %v158_v44  ;;  %v1787_v52 = vpack.c.bf16 %v181_v47, %v173_v46  ;;  %v172_v53 = vld [vmem:[#allocation7 + $0x200] sm:$0xff]  ;;  %v174_v55 = vld [vmem:[#allocation7 + $0x210] sm:$0xff] }
  0x69   :  { %1782 = vmatpush1.bf16.msra.mxu0 %v1781_v34  ;;  %v180_v54 = vld [vmem:[#allocation7 + $0x240] sm:$0xff]  ;;  %v1835_v56 = vpack.c.bf16 %v183_v49, %v175_v48  ;;  %v182_v57 = vld [vmem:[#allocation7 + $0x250] sm:$0xff]  ;;  %v189_v58 = vld [vmem:[#allocation7 + $0x288] sm:$0xff] }
  0x6a   :  { %1830 = vmatpush1.bf16.msra.mxu1 %v1829_v38  ;;  %1784 = vmatprep.subr.bf16.mxu0 %v1783_v39  ;;  %v197_v59 = vld [vmem:[#allocation7 + $0x2c8] sm:$0xff]  ;;  %v191_v60 = vld [vmem:[#allocation7 + $0x298] sm:$0xff]  ;;  %v1789_v62 = vpack.c.bf16 %v180_v54, %v172_v53  ;;  %v1837_v63 = vpack.c.bf16 %v182_v57, %v174_v55  ;;  %v188_v1 = vld [vmem:[#allocation7 + $0x280] sm:$0xff] }
  0x6b   :  { %1832 = vmatprep.subr.bf16.mxu1 %v1831_v43  ;;  %v199_v61 = vld [vmem:[#allocation7 + $0x2d8] sm:$0xff]  ;;  %v1791_v0 = vpack.c.bf16 %v197_v59, %v189_v58  ;;  %v196_v2 = vld [vmem:[#allocation7 + $0x2c0] sm:$0xff]  ;;  %v190_v3 = vld [vmem:[#allocation7 + $0x290] sm:$0xff] }
  0x6c   :  { %v1839_v4 = vpack.c.bf16 %v199_v61, %v191_v60  ;;  %v198_v5 = vld [vmem:[#allocation7 + $0x2d0] sm:$0xff]  ;;  %v205_v6 = vld [vmem:[#allocation7 + $0x308] sm:$0xff]  ;;  %v207_v8 = vld [vmem:[#allocation7 + $0x318] sm:$0xff]  ;;  %v1793_v10 = vpack.c.bf16 %v196_v2, %v188_v1 }
  0x6d   :  { %1786 = vmatpush1.bf16.msra.mxu0 %v1785_v50  ;;  %v213_v7 = vld [vmem:[#allocation7 + $0x348] sm:$0xff]  ;;  %v215_v9 = vld [vmem:[#allocation7 + $0x358] sm:$0xff]  ;;  %v1841_v11 = vpack.c.bf16 %v198_v5, %v190_v3  ;;  %v204_v13 = vld [vmem:[#allocation7 + $0x300] sm:$0xff] }
  0x6e   :  { %1834 = vmatpush1.bf16.msra.mxu1 %v1833_v51  ;;  %1788 = vmatprep.subr.bf16.mxu0 %v1787_v52  ;;  %v1795_v12 = vpack.c.bf16 %v213_v7, %v205_v6  ;;  %v212_v14 = vld [vmem:[#allocation7 + $0x340] sm:$0xff]  ;;  %v206_v15 = vld [vmem:[#allocation7 + $0x310] sm:$0xff]  ;;  %v1843_v16 = vpack.c.bf16 %v215_v9, %v207_v8  ;;  %v221_v18 = vld [vmem:[#allocation7 + $0x388] sm:$0xff] }
  0x6f   :  { %1836 = vmatprep.subr.bf16.mxu1 %v1835_v56  ;;  %v214_v17 = vld [vmem:[#allocation7 + $0x350] sm:$0xff]  ;;  %v229_v19 = vld [vmem:[#allocation7 + $0x3c8] sm:$0xff]  ;;  %v223_v20 = vld [vmem:[#allocation7 + $0x398] sm:$0xff]  ;;  %v1797_v22 = vpack.c.bf16 %v212_v14, %v204_v13 }
  0x70   :  { %v231_v21 = vld [vmem:[#allocation7 + $0x3d8] sm:$0xff]  ;;  %v1845_v23 = vpack.c.bf16 %v214_v17, %v206_v15  ;;  %v1799_v24 = vpack.c.bf16 %v229_v19, %v221_v18  ;;  %v220_v25 = vld [vmem:[#allocation7 + $0x380] sm:$0xff]  ;;  %v222_v27 = vld [vmem:[#allocation7 + $0x390] sm:$0xff] }
  0x71   :  { %1790 = vmatpush1.bf16.msra.mxu0 %v1789_v62  ;;  %v228_v26 = vld [vmem:[#allocation7 + $0x3c0] sm:$0xff]  ;;  %v1847_v28 = vpack.c.bf16 %v231_v21, %v223_v20  ;;  %v230_v29 = vld [vmem:[#allocation7 + $0x3d0] sm:$0xff]  ;;  %v237_v30 = vld [vmem:[#allocation7 + $0x408] sm:$0xff] }
  0x72   :  { %1838 = vmatpush1.bf16.msra.mxu1 %v1837_v63  ;;  %1792 = vmatprep.subr.bf16.mxu0 %v1791_v0  ;;  %v245_v31 = vld [vmem:[#allocation7 + $0x448] sm:$0xff]  ;;  %v239_v32 = vld [vmem:[#allocation7 + $0x418] sm:$0xff]  ;;  %v1801_v34 = vpack.c.bf16 %v228_v26, %v220_v25  ;;  %v1849_v35 = vpack.c.bf16 %v230_v29, %v222_v27  ;;  %v236_v37 = vld [vmem:[#allocation7 + $0x400] sm:$0xff] }
  0x73   :  { %1840 = vmatprep.subr.bf16.mxu1 %v1839_v4  ;;  %v247_v33 = vld [vmem:[#allocation7 + $0x458] sm:$0xff]  ;;  %v1803_v36 = vpack.c.bf16 %v245_v31, %v237_v30  ;;  %v244_v38 = vld [vmem:[#allocation7 + $0x440] sm:$0xff]  ;;  %v238_v39 = vld [vmem:[#allocation7 + $0x410] sm:$0xff] }
  0x74   :  { %v1851_v40 = vpack.c.bf16 %v247_v33, %v239_v32  ;;  %v246_v41 = vld [vmem:[#allocation7 + $0x450] sm:$0xff]  ;;  %v253_v42 = vld [vmem:[#allocation7 + $0x488] sm:$0xff]  ;;  %v255_v44 = vld [vmem:[#allocation7 + $0x498] sm:$0xff]  ;;  %v1805_v46 = vpack.c.bf16 %v244_v38, %v236_v37 }
  0x75   :  { %1794 = vmatpush1.bf16.msra.mxu0 %v1793_v10  ;;  %v261_v43 = vld [vmem:[#allocation7 + $0x4c8] sm:$0xff]  ;;  %v263_v45 = vld [vmem:[#allocation7 + $0x4d8] sm:$0xff]  ;;  %v1853_v48 = vpack.c.bf16 %v246_v41, %v238_v39  ;;  %v252_v50 = vld [vmem:[#allocation7 + $0x480] sm:$0xff] }
  0x76   :  { %1842 = vmatpush1.bf16.msra.mxu1 %v1841_v11  ;;  %1796 = vmatprep.subr.bf16.mxu0 %v1795_v12  ;;  %v2621_v47 = vld [vmem:[#allocation2 + $0x8] sm:$0xff]  ;;  %v1807_v49 = vpack.c.bf16 %v261_v43, %v253_v42  ;;  %v260_v51 = vld [vmem:[#allocation7 + $0x4c0] sm:$0xff]  ;;  %v254_v52 = vld [vmem:[#allocation7 + $0x490] sm:$0xff]  ;;  %v1855_v53 = vpack.c.bf16 %v263_v45, %v255_v44 }
  0x77   :  { %1844 = vmatprep.subr.bf16.mxu1 %v1843_v16  ;;  %v262_v54 = vld [vmem:[#allocation7 + $0x4d0] sm:$0xff]  ;;  %v269_v55 = vld [vmem:[#allocation7 + $0x508] sm:$0xff]  ;;  %1678 = vmatprep.mubr.msk.f32.mxu0 %vm342_vm0, %v2621_v47  ;;  %v271_v57 = vld [vmem:[#allocation7 + $0x518] sm:$0xff]  ;;  %v1809_v59 = vpack.c.bf16 %v260_v51, %v252_v50 }
  0x78   :  { %v277_v56 = vld [vmem:[#allocation7 + $0x548] sm:$0xff]  ;;  %v279_v58 = vld [vmem:[#allocation7 + $0x558] sm:$0xff]  ;;  %1680 = vmatprep.mubr.msk.f32.mxu1 %vm342_vm0, %v2621_v47  ;;  %v1857_v60 = vpack.c.bf16 %v262_v54, %v254_v52  ;;  %v268_v62 = vld [vmem:[#allocation7 + $0x500] sm:$0xff] }
  0x79   :  { %1798 = vmatpush1.bf16.msra.mxu0 %v1797_v22  ;;  %v1811_v61 = vpack.c.bf16 %v277_v56, %v269_v55  ;;  %v276_v63 = vld [vmem:[#allocation7 + $0x540] sm:$0xff]  ;;  %v270_v0 = vld [vmem:[#allocation7 + $0x510] sm:$0xff]  ;;  %v1859_v1 = vpack.c.bf16 %v279_v58, %v271_v57  ;;  %v285_v3 = vld [vmem:[#allocation7 + $0x588] sm:$0xff] }
  0x7a   :  { %1846 = vmatpush1.bf16.msra.mxu1 %v1845_v23  ;;  %1800 = vmatprep.subr.bf16.mxu0 %v1799_v24  ;;  %v278_v2 = vld [vmem:[#allocation7 + $0x550] sm:$0xff]  ;;  %v293_v4 = vld [vmem:[#allocation7 + $0x5c8] sm:$0xff]  ;;  %v287_v5 = vld [vmem:[#allocation7 + $0x598] sm:$0xff]  ;;  %v1813_v7 = vpack.c.bf16 %v276_v63, %v268_v62 }
  0x7b   :  { %1848 = vmatprep.subr.bf16.mxu1 %v1847_v28  ;;  %v295_v6 = vld [vmem:[#allocation7 + $0x5d8] sm:$0xff]  ;;  %v1861_v8 = vpack.c.bf16 %v278_v2, %v270_v0  ;;  %v1815_v9 = vpack.c.bf16 %v293_v4, %v285_v3  ;;  %v284_v10 = vld [vmem:[#allocation7 + $0x580] sm:$0xff]  ;;  %v286_v12 = vld [vmem:[#allocation7 + $0x590] sm:$0xff] }
  0x7c   :  { %v292_v11 = vld [vmem:[#allocation7 + $0x5c0] sm:$0xff]  ;;  %v1863_v13 = vpack.c.bf16 %v295_v6, %v287_v5  ;;  %v294_v14 = vld [vmem:[#allocation7 + $0x5d0] sm:$0xff]  ;;  %v113_v15 = vld [vmem:[#allocation7 + $0x28] sm:$0xff] }
  0x7d   :  { %1802 = vmatpush1.bf16.msra.mxu0 %v1801_v34  ;;  %v121_v16 = vld [vmem:[#allocation7 + $0x68] sm:$0xff]  ;;  %v115_v17 = vld [vmem:[#allocation7 + $0x38] sm:$0xff]  ;;  %v1817_v19 = vpack.c.bf16 %v292_v11, %v284_v10  ;;  %v1865_v20 = vpack.c.bf16 %v294_v14, %v286_v12  ;;  %v112_v22 = vld [vmem:[#allocation7 + $0x20] sm:$0xff] }
  0x7e   :  { %1850 = vmatpush1.bf16.msra.mxu1 %v1849_v35  ;;  %1804 = vmatprep.subr.bf16.mxu0 %v1803_v36  ;;  %v123_v18 = vld [vmem:[#allocation7 + $0x78] sm:$0xff]  ;;  %v1867_v21 = vpack.c.bf16 %v121_v16, %v113_v15  ;;  %v120_v23 = vld [vmem:[#allocation7 + $0x60] sm:$0xff]  ;;  %v114_v24 = vld [vmem:[#allocation7 + $0x30] sm:$0xff] }
  0x7f   :  { %1852 = vmatprep.subr.bf16.mxu1 %v1851_v40  ;;  %v1915_v25 = vpack.c.bf16 %v123_v18, %v115_v17  ;;  %v122_v26 = vld [vmem:[#allocation7 + $0x70] sm:$0xff]  ;;  %v129_v27 = vld [vmem:[#allocation7 + $0xa8] sm:$0xff]  ;;  %v131_v29 = vld [vmem:[#allocation7 + $0xb8] sm:$0xff]  ;;  %v1869_v32 = vpack.c.bf16 %v120_v23, %v112_v22 }
  0x80   :  { %v137_v28 = vld [vmem:[#allocation7 + $0xe8] sm:$0xff]  ;;  %v139_v30 = vld [vmem:[#allocation7 + $0xf8] sm:$0xff]  ;;  %v2627_v31 = vld [vmem:[#allocation2] sm:$0xff]  ;;  %v1917_v33 = vpack.c.bf16 %v122_v26, %v114_v24 }
  0x81   :  { %1806 = vmatpush1.bf16.msra.mxu0 %v1805_v46  ;;  %v1871_v34 = vpack.c.bf16 %v137_v28, %v129_v27  ;;  %v128_v35 = vld [vmem:[#allocation7 + $0xa0] sm:$0xff]  ;;  %v130_v37 = vld [vmem:[#allocation7 + $0xb0] sm:$0xff]  ;;  %v1919_v38 = vpack.c.bf16 %v139_v30, %v131_v29  ;;  %v145_v40 = vld [vmem:[#allocation7 + $0x128] sm:$0xff] }
  0x82   :  { %1854 = vmatpush1.bf16.msra.mxu1 %v1853_v48  ;;  %1808 = vmatprep.subr.bf16.mxu0 %v1807_v49  ;;  %v136_v36 = vld [vmem:[#allocation7 + $0xe0] sm:$0xff]  ;;  %v138_v39 = vld [vmem:[#allocation7 + $0xf0] sm:$0xff]  ;;  %v153_v41 = vld [vmem:[#allocation7 + $0x168] sm:$0xff] }
  0x83   :  { %1856 = vmatprep.subr.bf16.mxu1 %v1855_v53  ;;  %v147_v42 = vld [vmem:[#allocation7 + $0x138] sm:$0xff]  ;;  %v1873_v44 = vpack.c.bf16 %v136_v36, %v128_v35  ;;  %v1921_v45 = vpack.c.bf16 %v138_v39, %v130_v37  ;;  %v1875_v46 = vpack.c.bf16 %v153_v41, %v145_v40  ;;  %v144_v48 = vld [vmem:[#allocation7 + $0x120] sm:$0xff]  ;;  %v146_v50 = vld [vmem:[#allocation7 + $0x130] sm:$0xff] }
  0x84   :  { %v155_v43 = vld [vmem:[#allocation7 + $0x178] sm:$0xff]  ;;  %v152_v49 = vld [vmem:[#allocation7 + $0x160] sm:$0xff]  ;;  %v154_v52 = vld [vmem:[#allocation7 + $0x170] sm:$0xff] }
  0x85   :  { %1810 = vmatpush1.bf16.msra.mxu0 %v1809_v59  ;;  %v1923_v51 = vpack.c.bf16 %v155_v43, %v147_v42  ;;  %v161_v53 = vld [vmem:[#allocation7 + $0x1a8] sm:$0xff]  ;;  %v163_v55 = vld [vmem:[#allocation7 + $0x1b8] sm:$0xff]  ;;  %v1877_v57 = vpack.c.bf16 %v152_v49, %v144_v48  ;;  %v1925_v58 = vpack.c.bf16 %v154_v52, %v146_v50  ;;  %v162_v62 = vld [vmem:[#allocation7 + $0x1b0] sm:$0xff] }
  0x86   :  { %1858 = vmatpush1.bf16.msra.mxu1 %v1857_v60  ;;  %1812 = vmatprep.subr.bf16.mxu0 %v1811_v61  ;;  %v169_v54 = vld [vmem:[#allocation7 + $0x1e8] sm:$0xff]  ;;  %v171_v56 = vld [vmem:[#allocation7 + $0x1f8] sm:$0xff]  ;;  %v160_v60 = vld [vmem:[#allocation7 + $0x1a0] sm:$0xff] }
  0x87   :  { %1860 = vmatprep.subr.bf16.mxu1 %v1859_v1  ;;  %v1879_v59 = vpack.c.bf16 %v169_v54, %v161_v53  ;;  %v168_v61 = vld [vmem:[#allocation7 + $0x1e0] sm:$0xff]  ;;  %v1927_v63 = vpack.c.bf16 %v171_v56, %v163_v55  ;;  %v170_v0 = vld [vmem:[#allocation7 + $0x1f0] sm:$0xff]  ;;  %v177_v1 = vld [vmem:[#allocation7 + $0x228] sm:$0xff] }
  0x88   :  { %v185_v2 = vld [vmem:[#allocation7 + $0x268] sm:$0xff]  ;;  %v179_v3 = vld [vmem:[#allocation7 + $0x238] sm:$0xff]  ;;  %v1881_v5 = vpack.c.bf16 %v168_v61, %v160_v60  ;;  %v176_v6 = vld [vmem:[#allocation7 + $0x220] sm:$0xff] }
  0x89   :  { %1814 = vmatpush1.bf16.msra.mxu0 %v1813_v7  ;;  %v187_v4 = vld [vmem:[#allocation7 + $0x278] sm:$0xff]  ;;  %v184_v7 = vld [vmem:[#allocation7 + $0x260] sm:$0xff]  ;;  %v178_v10 = vld [vmem:[#allocation7 + $0x230] sm:$0xff] }
  0x8a   :  { %1862 = vmatpush1.bf16.msra.mxu1 %v1861_v8  ;;  %1816 = vmatprep.subr.bf16.mxu0 %v1815_v9  ;;  %v1929_v8 = vpack.c.bf16 %v170_v0, %v162_v62  ;;  %v1883_v9 = vpack.c.bf16 %v185_v2, %v177_v1  ;;  %v186_v11 = vld [vmem:[#allocation7 + $0x270] sm:$0xff]  ;;  %v193_v12 = vld [vmem:[#allocation7 + $0x2a8] sm:$0xff]  ;;  %v2631_v15 = vld [vmem:[#allocation2 + $0x18] sm:$0xff] }
  0x8b   :  { %1864 = vmatprep.subr.bf16.mxu1 %v1863_v13  ;;  %v1931_v13 = vpack.c.bf16 %v187_v4, %v179_v3  ;;  %v201_v14 = vld [vmem:[#allocation7 + $0x2e8] sm:$0xff]  ;;  %v2633_v16 = vld [vmem:[#allocation2 + $0x10] sm:$0xff]  ;;  %v195_v17 = vld [vmem:[#allocation7 + $0x2b8] sm:$0xff] }
  0x8c   :  { %v203_v18 = vld [vmem:[#allocation7 + $0x2f8] sm:$0xff]  ;;  %v192_v22 = vld [vmem:[#allocation7 + $0x2a0] sm:$0xff]  ;;  %v194_v24 = vld [vmem:[#allocation7 + $0x2b0] sm:$0xff] }
  0x8d   :  { %1818 = vmatpush1.bf16.msra.mxu0 %v1817_v19  ;;  %v1885_v19 = vpack.c.bf16 %v184_v7, %v176_v6  ;;  %v200_v23 = vld [vmem:[#allocation7 + $0x2e0] sm:$0xff]  ;;  %v202_v26 = vld [vmem:[#allocation7 + $0x2f0] sm:$0xff]  ;;  %v209_v27 = vld [vmem:[#allocation7 + $0x328] sm:$0xff] }
  0x8e   :  { %1866 = vmatpush1.bf16.msra.mxu1 %v1865_v20  ;;  %1868 = vmatprep.subr.bf16.mxu0 %v1867_v21  ;;  %v1933_v20 = vpack.c.bf16 %v186_v11, %v178_v10  ;;  %v1887_v21 = vpack.c.bf16 %v201_v14, %v193_v12  ;;  %v217_v28 = vld [vmem:[#allocation7 + $0x368] sm:$0xff]  ;;  %v211_v29 = vld [vmem:[#allocation7 + $0x338] sm:$0xff]  ;;  %v208_v35 = vld [vmem:[#allocation7 + $0x320] sm:$0xff] }
  0x8f   :  { %1916 = vmatprep.subr.bf16.mxu1 %v1915_v25  ;;  %v1935_v25 = vpack.c.bf16 %v203_v18, %v195_v17  ;;  %v219_v30 = vld [vmem:[#allocation7 + $0x378] sm:$0xff]  ;;  %v216_v36 = vld [vmem:[#allocation7 + $0x360] sm:$0xff]  ;;  %v210_v37 = vld [vmem:[#allocation7 + $0x330] sm:$0xff] }
  0x90   :  { %414 = vmatmul.mubr.f32.vlgmr.msra.gmra.mrb[0].mxu0 %v2627_v31  ;;  %v218_v39 = vld [vmem:[#allocation7 + $0x370] sm:$0xff]  ;;  %v225_v40 = vld [vmem:[#allocation7 + $0x3a8] sm:$0xff]  ;;  %v227_v42 = vld [vmem:[#allocation7 + $0x3b8] sm:$0xff] }
  0x91   :  { %491 = vmatmul.mubr.f32.vlgmr.msra.gmra.mrb[0].mxu1 %v2627_v31  ;;  %1870 = vmatpush1.bf16.msra.mxu0 %v1869_v32  ;;  %v1889_v32 = vpack.c.bf16 %v200_v23, %v192_v22  ;;  %v233_v41 = vld [vmem:[#allocation7 + $0x3e8] sm:$0xff]  ;;  %v235_v43 = vld [vmem:[#allocation7 + $0x3f8] sm:$0xff]  ;;  %v232_v48 = vld [vmem:[#allocation7 + $0x3e0] sm:$0xff] }
  0x92   :  { %1918 = vmatpush1.bf16.msra.mxu1 %v1917_v33  ;;  %1872 = vmatprep.subr.bf16.mxu0 %v1871_v34  ;;  %v1937_v33 = vpack.c.bf16 %v202_v26, %v194_v24  ;;  %v1891_v34 = vpack.c.bf16 %v217_v28, %v209_v27  ;;  %v226_v49 = vld [vmem:[#allocation7 + $0x3b0] sm:$0xff]  ;;  %v1943_v50 = vpack.c.bf16 %v235_v43, %v227_v42  ;;  %v241_v52 = vld [vmem:[#allocation7 + $0x428] sm:$0xff]  ;;  %v243_v54 = vld [vmem:[#allocation7 + $0x438] sm:$0xff] }
  0x93   :  { %1920 = vmatprep.subr.bf16.mxu1 %v1919_v38  ;;  %1679 = vmatprep.mubr.msk.f32.mxu0 %vm342_vm0, %v2631_v15  ;;  %v1939_v38 = vpack.c.bf16 %v219_v30, %v211_v29  ;;  %v249_v53 = vld [vmem:[#allocation7 + $0x468] sm:$0xff]  ;;  %v251_v55 = vld [vmem:[#allocation7 + $0x478] sm:$0xff]  ;;  %v248_v60 = vld [vmem:[#allocation7 + $0x460] sm:$0xff] }
  0x94   :  { %1681 = vmatprep.mubr.msk.f32.mxu1 %vm342_vm0, %v2631_v15  ;;  %420 = vmatmul.mubr.f32.gmra.mrb[2].mxu0 %v2633_v16  ;;  %v242_v61 = vld [vmem:[#allocation7 + $0x430] sm:$0xff]  ;;  %v1947_v62 = vpack.c.bf16 %v251_v55, %v243_v54  ;;  %v257_v0 = vld [vmem:[#allocation7 + $0x4a8] sm:$0xff]  ;;  %v259_v2 = vld [vmem:[#allocation7 + $0x4b8] sm:$0xff] }
  0x95   :  { %1874 = vmatpush1.bf16.msra.mxu0 %v1873_v44  ;;  %497 = vmatmul.mubr.f32.gmra.mrb[2].mxu1 %v2633_v16  ;;  %v1893_v44 = vpack.c.bf16 %v216_v36, %v208_v35  ;;  %v265_v1 = vld [vmem:[#allocation7 + $0x4e8] sm:$0xff]  ;;  %v267_v3 = vld [vmem:[#allocation7 + $0x4f8] sm:$0xff]  ;;  %v256_v7 = vld [vmem:[#allocation7 + $0x4a0] sm:$0xff] }
  0x96   :  { %1922 = vmatpush1.bf16.msra.mxu1 %v1921_v45  ;;  %1876 = vmatprep.subr.bf16.mxu0 %v1875_v46  ;;  %v1895_v45 = vpack.c.bf16 %v233_v41, %v225_v40  ;;  %v224_v46 = vld [vmem:[#allocation7 + $0x3a0] sm:$0xff]  ;;  %v1903_v6 = vpack.c.bf16 %v265_v1, %v257_v0  ;;  %v1951_v10 = vpack.c.bf16 %v267_v3, %v259_v2  ;;  %v266_v11 = vld [vmem:[#allocation7 + $0x4f0] sm:$0xff]  ;;  %v273_v12 = vld [vmem:[#allocation7 + $0x528] sm:$0xff] }
  0x97   :  { %1924 = vmatprep.subr.bf16.mxu1 %v1923_v51  ;;  %1682 = vmatprep.mubr.msk.f32.mxu0 %vm342_vm0, %v2621_v47  ;;  %v234_v51 = vld [vmem:[#allocation7 + $0x3f0] sm:$0xff]  ;;  %v1897_v56 = vpack.c.bf16 %v232_v48, %v224_v46  ;;  %v275_v14 = vld [vmem:[#allocation7 + $0x538] sm:$0xff]  ;;  %v280_v22 = vld [vmem:[#allocation7 + $0x560] sm:$0xff] }
  0x98   :  { %1684 = vmatprep.mubr.msk.f32.mxu1 %vm342_vm0, %v2621_v47  ;;  %v1941_v47 = vpack.c.bf16 %v218_v39, %v210_v37  ;;  %v283_v17 = vld [vmem:[#allocation7 + $0x578] sm:$0xff]  ;;  %v274_v23 = vld [vmem:[#allocation7 + $0x530] sm:$0xff]  ;;  %v289_v26 = vld [vmem:[#allocation7 + $0x5a8] sm:$0xff] }
  0x99   :  { %1878 = vmatpush1.bf16.msra.mxu0 %v1877_v57  ;;  %v1945_v57 = vpack.c.bf16 %v234_v51, %v226_v49  ;;  %v1955_v24 = vpack.c.bf16 %v283_v17, %v275_v14  ;;  %v297_v27 = vld [vmem:[#allocation7 + $0x5e8] sm:$0xff]  ;;  %v291_v28 = vld [vmem:[#allocation7 + $0x5b8] sm:$0xff]  ;;  %v296_v35 = vld [vmem:[#allocation7 + $0x5e0] sm:$0xff] }
  0x9a   :  { %1926 = vmatpush1.bf16.msra.mxu1 %v1925_v58  ;;  %1880 = vmatprep.subr.bf16.mxu0 %v1879_v59  ;;  %v1899_v58 = vpack.c.bf16 %v249_v53, %v241_v52  ;;  %v240_v59 = vld [vmem:[#allocation7 + $0x420] sm:$0xff]  ;;  %v299_v29 = vld [vmem:[#allocation7 + $0x5f8] sm:$0xff]  ;;  %v290_v37 = vld [vmem:[#allocation7 + $0x5b0] sm:$0xff] }
  0x9b   :  { %1928 = vmatprep.subr.bf16.mxu1 %v1927_v63  ;;  %v250_v63 = vld [vmem:[#allocation7 + $0x470] sm:$0xff]  ;;  %v1901_v4 = vpack.c.bf16 %v248_v60, %v240_v59  ;;  %v1959_v36 = vpack.c.bf16 %v299_v29, %v291_v28  ;;  %v300_v52 = vld [vmem:[%s2828_s3] sm:$0xff] }
  0x9d   :  { %1882 = vmatpush1.bf16.msra.mxu0 %v1881_v5  ;;  %v1949_v5 = vpack.c.bf16 %v250_v63, %v242_v61 }
  0x9e   :  { %1930 = vmatpush1.bf16.msra.mxu1 %v1929_v8  ;;  %1884 = vmatprep.subr.bf16.mxu0 %v1883_v9  ;;  %v264_v8 = vld [vmem:[#allocation7 + $0x4e0] sm:$0xff]  ;;  %v258_v9 = vld [vmem:[#allocation7 + $0x4b0] sm:$0xff] }
  0x9f   :  { %1932 = vmatprep.subr.bf16.mxu1 %v1931_v13  ;;  %v281_v13 = vld [vmem:[#allocation7 + $0x568] sm:$0xff]  ;;  %v1905_v18 = vpack.c.bf16 %v264_v8, %v256_v7 }
  0xa1   :  { %1886 = vmatpush1.bf16.msra.mxu0 %v1885_v19  ;;  %v1953_v19 = vpack.c.bf16 %v266_v11, %v258_v9 }
  0xa2   :  { %1934 = vmatpush1.bf16.msra.mxu1 %v1933_v20  ;;  %1888 = vmatprep.subr.bf16.mxu0 %v1887_v21  ;;  %v1907_v20 = vpack.c.bf16 %v281_v13, %v273_v12  ;;  %v272_v21 = vld [vmem:[#allocation7 + $0x520] sm:$0xff] }
  0xa3   :  { %1936 = vmatprep.subr.bf16.mxu1 %v1935_v25  ;;  %v282_v25 = vld [vmem:[#allocation7 + $0x570] sm:$0xff]  ;;  %v1909_v30 = vpack.c.bf16 %v280_v22, %v272_v21 }
  0xa5   :  { %1890 = vmatpush1.bf16.msra.mxu0 %v1889_v32  ;;  %v1957_v32 = vpack.c.bf16 %v282_v25, %v274_v23 }
  0xa6   :  { %1938 = vmatpush1.bf16.msra.mxu1 %v1937_v33  ;;  %1892 = vmatprep.subr.bf16.mxu0 %v1891_v34  ;;  %v1911_v33 = vpack.c.bf16 %v297_v27, %v289_v26  ;;  %v288_v34 = vld [vmem:[#allocation7 + $0x5a0] sm:$0xff] }
  0xa7   :  { %1940 = vmatprep.subr.bf16.mxu1 %v1939_v38  ;;  %v298_v38 = vld [vmem:[#allocation7 + $0x5f0] sm:$0xff]  ;;  %v1913_v39 = vpack.c.bf16 %v296_v35, %v288_v34 }
  0xa8   :  { %v1961_v40 = vpack.c.bf16 %v298_v38, %v290_v37 }
  0xa9   :  { %1894 = vmatpush1.bf16.msra.mxu0 %v1893_v44 }
  0xaa   :  { %1942 = vmatpush1.bf16.msra.mxu1 %v1941_v47  ;;  %1896 = vmatprep.subr.bf16.mxu0 %v1895_v45 }
  0xab   :  { %1944 = vmatprep.subr.bf16.mxu1 %v1943_v50 }
  0xad   :  { %1898 = vmatpush1.bf16.msra.mxu0 %v1897_v56 }
  0xae   :  { %1946 = vmatpush1.bf16.msra.mxu1 %v1945_v57  ;;  %1900 = vmatprep.subr.bf16.mxu0 %v1899_v58 }
  0xaf   :  { %1948 = vmatprep.subr.bf16.mxu1 %v1947_v62 }
  0xb1   :  { %1902 = vmatpush1.bf16.msra.mxu0 %v1901_v4 }
  0xb2   :  { %1950 = vmatpush1.bf16.msra.mxu1 %v1949_v5  ;;  %1904 = vmatprep.subr.bf16.mxu0 %v1903_v6 }
  0xb3   :  { %1952 = vmatprep.subr.bf16.mxu1 %v1951_v10 }
  0xb5   :  { %1906 = vmatpush1.bf16.msra.mxu0 %v1905_v18 }
  0xb6   :  { %1954 = vmatpush1.bf16.msra.mxu1 %v1953_v19  ;;  %1908 = vmatprep.subr.bf16.mxu0 %v1907_v20 }
  0xb7   :  { %1956 = vmatprep.subr.bf16.mxu1 %v1955_v24 }
  0xb9   :  { %1910 = vmatpush1.bf16.msra.mxu0 %v1909_v30 }
  0xba   :  { %1958 = vmatpush1.bf16.msra.mxu1 %v1957_v32  ;;  %1912 = vmatprep.subr.bf16.mxu0 %v1911_v33 }
  0xbb   :  { %1960 = vmatprep.subr.bf16.mxu1 %v1959_v36 }
  0xbd   :  { %1914 = vmatpush1.bf16.msra.mxu0 %v1913_v39 }
  0xbe   :  { %1962 = vmatpush1.bf16.msra.mxu1 %v1961_v40 }
  0xc0   :  { %568 = vmatmul.mubr.f32.vlgmr.msra.gmra.mrb[4].mxu0 %v2627_v31 }
  0xc1   :  { %645 = vmatmul.mubr.f32.vlgmr.msra.gmra.mrb[4].mxu1 %v2627_v31  ;;  %1683 = vmatprep.mubr.msk.f32.mxu0 %vm342_vm0, %v2631_v15 }
  0xc2   :  { %1685 = vmatprep.mubr.msk.f32.mxu1 %vm342_vm0, %v2631_v15  ;;  %v302_v15 = vlaneseq }
  0xc4   :  { %574 = vmatmul.mubr.f32.gmra.mrb[6].mxu0 %v2633_v16  ;;  %v303_v48 = vshrl.u32 %v302_v15, 7 }
  0xc5   :  { %651 = vmatmul.mubr.f32.gmra.mrb[6].mxu1 %v2633_v16 }
  0xc6   :  { %v320_v49 = vsub.s32 4, %v303_v48  ;;  %v328_v16 = vsub.s32 6, %v303_v48  ;;  %v324_v50 = vsub.s32 5, %v303_v48  ;;  %v332_v51 = vsub.s32 7, %v303_v48 }
  0xc7   :  { %v2672_v20 = vsub.s32 0, %v303_v48  ;;  %v2674_v22 = vsub.s32 2, %v303_v48  ;;  %v2676_v25 = vsub.s32 1, %v303_v48  ;;  %v2678_v28 = vsub.s32 3, %v303_v48 }
  0xc8   :  { %v321_v53 = vrot.slane %v300_v52, %v320_v49  ;;  %v329_v54 = vrot.slane %v300_v52, %v328_v16  ;;  %v325_v55 = vrot.slane %v300_v52, %v324_v50  ;;  %v333_v56 = vrot.slane %v300_v52, %v332_v51  ;;  %v657_v50 = vld [vmem:[#allocation5] sm:$0xff] }
  0xc9   :  { %v305_v32 = vrot.slane %v300_v52, %v2672_v20  ;;  %v313_v35 = vrot.slane %v300_v52, %v2674_v22  ;;  %v309_v38 = vrot.slane %v300_v52, %v2676_v25  ;;  %v317_v15 = vrot.slane %v300_v52, %v2678_v28 }
 0x163   :  { %v2653_v41 = vpop.f32.mrb[0].mxu0 }
 0x164   :  { %v2655_v42 = vpop.f32.mrb[1].mxu0  ;;  %v2657_v43 = vpop.f32.mrb[0].mxu1  ;;  %v416_v49 = vadd.f32 %v2653_v41, %v305_v32  ;;  %v661_v41 = vld [vmem:[#allocation5 + $0x20] sm:$0xff] }
 0x165   :  { %v2659_v44 = vpop.f32.mrb[1].mxu1  ;;  %v493_v51 = vadd.f32 %v2657_v43, %v313_v35 }
 0x167   :  { %v2665_v45 = vpop.f32.mrb[2].mxu0 }
 0x168   :  { %v2661_v47 = vpop.f32.mrb[2].mxu1  ;;  %v2667_v46 = vpop.f32.mrb[3].mxu0  ;;  %v422_v52 = vadd.f32 %v2665_v45, %v305_v32  ;;  %v845_v32 = vld [vmem:[#allocation8 + $0x18] sm:$0xff] }
 0x169   :  { %v2663_v31 = vpop.f32.mrb[3].mxu1  ;;  %v424_v43 = vadd.f32 %v2667_v46, %v309_v38 }
 0x193   :  { %v569_v57 = vpop.f32.mrb[4].mxu0 }
 0x194   :  { %v570_v58 = vadd.f32 %v569_v57, %v321_v53  ;;  %v646_v59 = vpop.f32.mrb[4].mxu1  ;;  %v571_v60 = vpop.f32.mrb[5].mxu0  ;;  %v665_v57 = vadd.f32 %v657_v50, %v416_v49  ;;  %v855_v49 = vld [vmem:[#allocation8 + $0x68] sm:$0xff]  ;;  %v857_v50 = vld [vmem:[#allocation8 + $0x78] sm:$0xff] }
 0x195   :  { %v647_v61 = vadd.f32 %v646_v59, %v329_v54  ;;  %v572_v62 = vadd.f32 %v571_v60, %v325_v55  ;;  %v648_v63 = vpop.f32.mrb[5].mxu1 }
 0x196   :  { %v1686_v0 = vmul.f32 -1.442695, %v570_v58  ;;  %v649_v1 = vadd.f32 %v648_v63, %v333_v56  ;;  %v660_v58 = vld [vmem:[#allocation5 + $0x18] sm:$0xff] }
 0x197   :  { %v1688_v2 = vmul.f32 -1.442695, %v647_v61  ;;  %v1687_v3 = vmul.f32 -1.442695, %v572_v62  ;;  %v575_v4 = vpop.f32.mrb[6].mxu0  ;;  %v499_v61 = vadd.f32 %v2661_v47, %v313_v35  ;;  %v842_v35 = vld [vmem:[#allocation8] sm:$0xff] }
 0x198   :  { %2313 = vpow2.f32 %v1686_v0  ;;  %v1689_v5 = vmul.f32 -1.442695, %v649_v1  ;;  %v576_v6 = vadd.f32 %v575_v4, %v321_v53  ;;  %v652_v7 = vpop.f32.mrb[6].mxu1  ;;  %v577_v8 = vpop.f32.mrb[7].mxu0  ;;  %v418_v53 = vadd.f32 %v2655_v42, %v309_v38  ;;  %v663_v0 = vld [vmem:[#allocation5 + $0x30] sm:$0xff] }
 0x199   :  { %2315 = vpow2.f32 %v1688_v2  ;;  %v653_v9 = vadd.f32 %v652_v7, %v329_v54  ;;  %v578_v10 = vadd.f32 %v577_v8, %v325_v55  ;;  %v654_v11 = vpop.f32.mrb[7].mxu1  ;;  %v659_v54 = vld [vmem:[#allocation5 + $0x10] sm:$0xff]  ;;  %v658_v55 = vld [vmem:[#allocation5 + $0x8] sm:$0xff]  ;;  %v671_v8 = vadd.f32 %v663_v0, %v499_v61  ;;  %v861_v61 = vld [vmem:[#allocation8 + $0x98] sm:$0xff] }
 0x19a   :  { %2317 = vpow2.f32 %v1687_v3  ;;  %v1690_v12 = vmul.f32 -1.442695, %v576_v6  ;;  %v655_v13 = vadd.f32 %v654_v11, %v333_v56  ;;  %v495_v56 = vadd.f32 %v2659_v44, %v317_v15  ;;  %v662_v3 = vld [vmem:[#allocation5 + $0x28] sm:$0xff]  ;;  %v664_v6 = vld [vmem:[#allocation5 + $0x38] sm:$0xff]  ;;  %v862_v0 = vld [vmem:[#allocation8 + $0xa0] sm:$0xff] }
 0x19b   :  { %2319 = vpow2.f32 %v1689_v5  ;;  %v1692_v14 = vmul.f32 -1.442695, %v653_v9  ;;  %v1691_v17 = vmul.f32 -1.442695, %v578_v10  ;;  %v667_v60 = vadd.f32 %v659_v54, %v493_v51  ;;  %v850_v54 = vld [vmem:[#allocation8 + $0x40] sm:$0xff] }
 0x19c   :  { %2321 = vpow2.f32 %v1690_v12  ;;  %v1693_v18 = vmul.f32 -1.442695, %v655_v13  ;;  %v666_v63 = vadd.f32 %v658_v55, %v418_v53  ;;  %v668_v2 = vadd.f32 %v660_v58, %v495_v56  ;;  %v854_v55 = vld [vmem:[#allocation8 + $0x60] sm:$0xff]  ;;  %v852_v56 = vld [vmem:[#allocation8 + $0x50] sm:$0xff] }
 0x19d   :  { %2323 = vpow2.f32 %v1692_v14  ;;  %v501_v44 = vadd.f32 %v2663_v31, %v317_v15  ;;  %v669_v5 = vadd.f32 %v661_v41, %v422_v52  ;;  %v670_v10 = vadd.f32 %v662_v3, %v424_v43  ;;  %v851_v15 = vld [vmem:[#allocation8 + $0x48] sm:$0xff]  ;;  %v856_v58 = vld [vmem:[#allocation8 + $0x70] sm:$0xff] }
 0x19e   :  { %2325 = vpow2.f32 %v1691_v17  ;;  %v1967_v51 = vpack.c.bf16 %v855_v49, %v851_v15  ;;  %v859_v52 = vld [vmem:[#allocation8 + $0x88] sm:$0xff]  ;;  %v882_v49 = vld [vmem:[#allocation8 + $0x140] sm:$0xff] }
 0x19f   :  { %2327 = vpow2.f32 %v1693_v18  ;;  %v672_v31 = vadd.f32 %v664_v6, %v501_v44  ;;  %v867_v44 = vld [vmem:[#allocation8 + $0xc8] sm:$0xff] }
 0x1a2   :  { %v2314_v19 = vpop.eup %2313 }
 0x1a3   :  { %v2316_v21 = vpop.eup %2315  ;;  %v697_v23 = vadd.f32 1.0, %v2314_v19 }
 0x1a4   :  { %v2318_v24 = vpop.eup %2317  ;;  %v699_v26 = vadd.f32 1.0, %v2316_v21 }
 0x1a5   :  { %v2320_v27 = vpop.eup %2319  ;;  %2329 = vrcp.f32 %v697_v23  ;;  %v698_v29 = vadd.f32 1.0, %v2318_v24 }
 0x1a6   :  { %v2322_v30 = vpop.eup %2321  ;;  %2331 = vrcp.f32 %v699_v26  ;;  %v700_v33 = vadd.f32 1.0, %v2320_v27 }
 0x1a7   :  { %v2324_v34 = vpop.eup %2323  ;;  %2333 = vrcp.f32 %v698_v29  ;;  %v701_v36 = vadd.f32 1.0, %v2322_v30  ;;  %v843_v29 = vld [vmem:[#allocation8 + $0x8] sm:$0xff] }
 0x1a8   :  { %v2326_v37 = vpop.eup %2325  ;;  %2335 = vrcp.f32 %v700_v33  ;;  %v703_v39 = vadd.f32 1.0, %v2324_v34  ;;  %v847_v30 = vld [vmem:[#allocation8 + $0x28] sm:$0xff]  ;;  %v849_v34 = vld [vmem:[#allocation8 + $0x38] sm:$0xff] }
 0x1a9   :  { %v2328_v40 = vpop.eup %2327  ;;  %2337 = vrcp.f32 %v701_v36  ;;  %v702_v48 = vadd.f32 1.0, %v2326_v37  ;;  %v1963_v33 = vpack.c.bf16 %v847_v30, %v843_v29  ;;  %v846_v36 = vld [vmem:[#allocation8 + $0x20] sm:$0xff]  ;;  %v2091_v37 = vpack.c.bf16 %v849_v34, %v845_v32 }
 0x1aa   :  { %2339 = vrcp.f32 %v703_v39  ;;  %v704_v16 = vadd.f32 1.0, %v2328_v40  ;;  %v1965_v38 = vpack.c.bf16 %v846_v36, %v842_v35  ;;  %v844_v39 = vld [vmem:[#allocation8 + $0x10] sm:$0xff]  ;;  %v874_v30 = vld [vmem:[#allocation8 + $0x100] sm:$0xff]  ;;  %v883_v36 = vld [vmem:[#allocation8 + $0x148] sm:$0xff] }
 0x1ab   :  { %2341 = vrcp.f32 %v702_v48  ;;  %v848_v40 = vld [vmem:[#allocation8 + $0x30] sm:$0xff]  ;;  %1964 = vmatprep.subr.bf16.mxu0 %v1963_v33  ;;  %2092 = vmatprep.subr.bf16.mxu1 %v2091_v37  ;;  %v878_v32 = vld [vmem:[#allocation8 + $0x120] sm:$0xff]  ;;  %v887_v37 = vld [vmem:[#allocation8 + $0x168] sm:$0xff] }
 0x1ac   :  { %2343 = vrcp.f32 %v704_v16  ;;  %v2093_v48 = vpack.c.bf16 %v848_v40, %v844_v39  ;;  %v853_v16 = vld [vmem:[#allocation8 + $0x58] sm:$0xff]  ;;  %1966 = vmatpush1.bf16.msra.mxu0 %v1965_v38  ;;  %v876_v33 = vld [vmem:[#allocation8 + $0x110] sm:$0xff]  ;;  %v1981_v40 = vpack.c.bf16 %v878_v32, %v874_v30  ;;  %v915_v32 = vld [vmem:[#allocation8 + $0x248] sm:$0xff] }
 0x1ad   :  { %v2095_v53 = vpack.c.bf16 %v857_v50, %v853_v16  ;;  %1968 = vmatprep.subr.bf16.mxu0 %v1967_v51  ;;  %v880_v35 = vld [vmem:[#allocation8 + $0x130] sm:$0xff]  ;;  %v885_v38 = vld [vmem:[#allocation8 + $0x158] sm:$0xff]  ;;  %v886_v16 = vld [vmem:[#allocation8 + $0x160] sm:$0xff] }
 0x1ae   :  { %2094 = vmatpush1.bf16.msra.mxu1 %v2093_v48  ;;  %v889_v39 = vld [vmem:[#allocation8 + $0x178] sm:$0xff]  ;;  %v2109_v15 = vpack.c.bf16 %v880_v35, %v876_v33  ;;  %v1983_v48 = vpack.c.bf16 %v887_v37, %v883_v36  ;;  %v884_v50 = vld [vmem:[#allocation8 + $0x150] sm:$0xff]  ;;  %v919_v33 = vld [vmem:[#allocation8 + $0x268] sm:$0xff] }
 0x1af   :  { %v2330_v59 = vpop.eup %2329  ;;  %2096 = vmatprep.subr.bf16.mxu1 %v2095_v53  ;;  %v2111_v51 = vpack.c.bf16 %v889_v39, %v885_v38  ;;  %v888_v53 = vld [vmem:[#allocation8 + $0x170] sm:$0xff]  ;;  %v921_v35 = vld [vmem:[#allocation8 + $0x278] sm:$0xff]  ;;  %v1999_v38 = vpack.c.bf16 %v919_v33, %v915_v32  ;;  %v914_v39 = vld [vmem:[#allocation8 + $0x240] sm:$0xff] }
 0x1b0   :  { %v2332_v62 = vpop.eup %2331  ;;  %v2691_v42 = vmul.f32 %v2330_v59, %v665_v57  ;;  %v1969_v57 = vpack.c.bf16 %v854_v55, %v850_v54  ;;  %v863_v59 = vld [vmem:[#allocation8 + $0xa8] sm:$0xff]  ;;  %v912_v30 = vld [vmem:[#allocation8 + $0x230] sm:$0xff] }
 0x1b1   :  { %v2334_v1 = vpop.eup %2333  ;;  %v2694_v4 = vmul.f32 %v2332_v62, %v667_v60  ;;  %v2097_v60 = vpack.c.bf16 %v856_v58, %v852_v56  ;;  %v1971_v41 = vpack.c.bf16 %v863_v59, %v859_v52  ;;  %v865_v62 = vld [vmem:[#allocation8 + $0xb8] sm:$0xff]  ;;  %v891_v54 = vld [vmem:[#allocation8 + $0x188] sm:$0xff]  ;;  %v1985_v58 = vpack.c.bf16 %v886_v16, %v882_v49  ;;  %v920_v49 = vld [vmem:[#allocation8 + $0x270] sm:$0xff] }
 0x1b2   :  { %v2336_v45 = vpop.eup %2335  ;;  %v2696_v7 = vmul.f32 %v2334_v1, %v666_v63  ;;  %v858_v63 = vld [vmem:[#allocation8 + $0x80] sm:$0xff]  ;;  %v2099_v43 = vpack.c.bf16 %v865_v62, %v861_v61  ;;  %v860_v1 = vld [vmem:[#allocation8 + $0x90] sm:$0xff]  ;;  %1970 = vmatpush1.bf16.msra.mxu0 %v1969_v57  ;;  %v895_v55 = vld [vmem:[#allocation8 + $0x1a8] sm:$0xff]  ;;  %v2113_v52 = vpack.c.bf16 %v888_v53, %v884_v50 }
 0x1b3   :  { %v2338_v47 = vpop.eup %2337  ;;  %v2698_v9 = vmul.f32 %v2336_v45, %v668_v2  ;;  %v864_v2 = vld [vmem:[#allocation8 + $0xb0] sm:$0xff]  ;;  %v1973_v3 = vpack.c.bf16 %v862_v0, %v858_v63  ;;  %v871_v45 = vld [vmem:[#allocation8 + $0xe8] sm:$0xff]  ;;  %2098 = vmatpush1.bf16.msra.mxu1 %v2097_v60  ;;  %1972 = vmatprep.subr.bf16.mxu0 %v1971_v41  ;;  %v893_v56 = vld [vmem:[#allocation8 + $0x198] sm:$0xff]  ;;  %v1987_v59 = vpack.c.bf16 %v895_v55, %v891_v54 }
 0x1b4   :  { %v2340_v46 = vpop.eup %2339  ;;  %v729_v11 = vadd.f32 %v2696_v7, %v2691_v42  ;;  %v2702_v12 = vmul.f32 %v2338_v47, %v669_v5  ;;  %v869_v5 = vld [vmem:[#allocation8 + $0xd8] sm:$0xff]  ;;  %v2101_v6 = vpack.c.bf16 %v864_v2, %v860_v1  ;;  %v1975_v47 = vpack.c.bf16 %v871_v45, %v867_v44  ;;  %2100 = vmatprep.subr.bf16.mxu1 %v2099_v43  ;;  %v890_v60 = vld [vmem:[#allocation8 + $0x180] sm:$0xff]  ;;  %v892_v61 = vld [vmem:[#allocation8 + $0x190] sm:$0xff] }
 0x1b5   :  { %v2342_v13 = vpop.eup %2341  ;;  %v2704_v14 = vmul.f32 %v2340_v46, %v671_v8  ;;  %v873_v8 = vld [vmem:[#allocation8 + $0xf8] sm:$0xff]  ;;  %v866_v46 = vld [vmem:[#allocation8 + $0xc0] sm:$0xff]  ;;  %v896_v63 = vld [vmem:[#allocation8 + $0x1b0] sm:$0xff] }
 0x1b6   :  { %v2344_v17 = vpop.eup %2343  ;;  %v730_v18 = vadd.f32 %v729_v11, %v2694_v4  ;;  %v2707_v19 = vmul.f32 %v2342_v13, %v670_v10  ;;  %v870_v10 = vld [vmem:[#allocation8 + $0xe0] sm:$0xff]  ;;  %v2103_v11 = vpack.c.bf16 %v873_v8, %v869_v5  ;;  %v868_v13 = vld [vmem:[#allocation8 + $0xd0] sm:$0xff]  ;;  %1974 = vmatpush1.bf16.msra.mxu0 %v1973_v3  ;;  %v897_v57 = vld [vmem:[#allocation8 + $0x1b8] sm:$0xff]  ;;  %v2117_v44 = vpack.c.bf16 %v896_v63, %v892_v61 }
 0x1b7   :  { %v2709_v21 = vmul.f32 %v2344_v17, %v672_v31  ;;  %v872_v31 = vld [vmem:[#allocation8 + $0xf0] sm:$0xff]  ;;  %v875_v17 = vld [vmem:[#allocation8 + $0x108] sm:$0xff]  ;;  %2102 = vmatpush1.bf16.msra.mxu1 %v2101_v6  ;;  %1976 = vmatprep.subr.bf16.mxu0 %v1975_v47  ;;  %v894_v41 = vld [vmem:[#allocation8 + $0x1a0] sm:$0xff]  ;;  %v2115_v62 = vpack.c.bf16 %v897_v57, %v893_v56 }
 0x1b8   :  { %v731_v23 = vadd.f32 %v730_v18, %v2698_v9  ;;  %v734_v24 = vadd.f32 %v2707_v19, %v2702_v12  ;;  %v879_v18 = vld [vmem:[#allocation8 + $0x128] sm:$0xff]  ;;  %2104 = vmatprep.subr.bf16.mxu1 %v2103_v11  ;;  %v901_v1 = vld [vmem:[#allocation8 + $0x1d8] sm:$0xff]  ;;  %v1989_v3 = vpack.c.bf16 %v894_v41, %v890_v60  ;;  %v898_v5 = vld [vmem:[#allocation8 + $0x1c0] sm:$0xff] }
 0x1b9   :  { %v1979_v29 = vpack.c.bf16 %v879_v18, %v875_v17  ;;  %v899_v43 = vld [vmem:[#allocation8 + $0x1c8] sm:$0xff]  ;;  %v905_v2 = vld [vmem:[#allocation8 + $0x1f8] sm:$0xff]  ;;  %v902_v6 = vld [vmem:[#allocation8 + $0x1e0] sm:$0xff] }
 0x1ba   :  { %732 = vadd.xlane.f32.xlu0 %v731_v23  ;;  %v735_v26 = vadd.f32 %v734_v24, %v2704_v14  ;;  %v877_v23 = vld [vmem:[#allocation8 + $0x118] sm:$0xff]  ;;  %v903_v0 = vld [vmem:[#allocation8 + $0x1e8] sm:$0xff]  ;;  %v900_v47 = vld [vmem:[#allocation8 + $0x1d0] sm:$0xff]  ;;  %v2119_v8 = vpack.c.bf16 %v905_v2, %v901_v1  ;;  %v1993_v17 = vpack.c.bf16 %v902_v6, %v898_v5 }
 0x1bb   :  { %v881_v24 = vld [vmem:[#allocation8 + $0x138] sm:$0xff]  ;;  %v1991_v45 = vpack.c.bf16 %v903_v0, %v899_v43  ;;  %v911_v11 = vld [vmem:[#allocation8 + $0x228] sm:$0xff]  ;;  %v922_v57 = vld [vmem:[#allocation8 + $0x280] sm:$0xff] }
 0x1bc   :  { %v736_v27 = vadd.f32 %v735_v26, %v2709_v21  ;;  %v1977_v26 = vpack.c.bf16 %v870_v10, %v866_v46  ;;  %v2107_v34 = vpack.c.bf16 %v881_v24, %v877_v23  ;;  %v904_v46 = vld [vmem:[#allocation8 + $0x1f0] sm:$0xff]  ;;  %v907_v10 = vld [vmem:[#allocation8 + $0x208] sm:$0xff]  ;;  %v906_v24 = vld [vmem:[#allocation8 + $0x200] sm:$0xff] }
 0x1bd   :  { %v2121_v18 = vpack.c.bf16 %v904_v46, %v900_v47  ;;  %v1995_v23 = vpack.c.bf16 %v911_v11, %v907_v10  ;;  %v923_v16 = vld [vmem:[#allocation8 + $0x288] sm:$0xff]  ;;  %v929_v53 = vld [vmem:[#allocation8 + $0x2b8] sm:$0xff]  ;;  %v928_v60 = vld [vmem:[#allocation8 + $0x2b0] sm:$0xff] }
 0x1be   :  { %737 = vadd.xlane.f32.xlu0 %v736_v27  ;;  %v2105_v27 = vpack.c.bf16 %v872_v31, %v868_v13  ;;  %1978 = vmatpush1.bf16.msra.mxu0 %v1977_v26  ;;  %v909_v13 = vld [vmem:[#allocation8 + $0x218] sm:$0xff]  ;;  %v910_v26 = vld [vmem:[#allocation8 + $0x220] sm:$0xff]  ;;  %v927_v50 = vld [vmem:[#allocation8 + $0x2a8] sm:$0xff] }
 0x1bf   :  { %1980 = vmatprep.subr.bf16.mxu0 %v1979_v29  ;;  %v913_v31 = vld [vmem:[#allocation8 + $0x238] sm:$0xff]  ;;  %v1997_v36 = vpack.c.bf16 %v910_v26, %v906_v24  ;;  %v2003_v56 = vpack.c.bf16 %v927_v50, %v923_v16  ;;  %v932_v33 = vld [vmem:[#allocation8 + $0x2d0] sm:$0xff] }
 0x1c0   :  { %2106 = vmatpush1.bf16.msra.mxu1 %v2105_v27  ;;  %v908_v27 = vld [vmem:[#allocation8 + $0x210] sm:$0xff]  ;;  %v2123_v29 = vpack.c.bf16 %v913_v31, %v909_v13  ;;  %v937_v26 = vld [vmem:[#allocation8 + $0x2f8] sm:$0xff] }
 0x1c1   :  { %2108 = vmatprep.subr.bf16.mxu1 %v2107_v34  ;;  %v917_v34 = vld [vmem:[#allocation8 + $0x258] sm:$0xff]  ;;  %v2125_v37 = vpack.c.bf16 %v912_v30, %v908_v27  ;;  %v930_v27 = vld [vmem:[#allocation8 + $0x2c0] sm:$0xff]  ;;  %v940_v50 = vld [vmem:[#allocation8 + $0x310] sm:$0xff] }
 0x1c2   :  { %1982 = vmatpush1.bf16.msra.mxu0 %v1981_v40  ;;  %v918_v40 = vld [vmem:[#allocation8 + $0x260] sm:$0xff] }
 0x1c3   :  { %1984 = vmatprep.subr.bf16.mxu0 %v1983_v48  ;;  %v2127_v48 = vpack.c.bf16 %v921_v35, %v917_v34  ;;  %v2001_v54 = vpack.c.bf16 %v918_v40, %v914_v39  ;;  %v936_v34 = vld [vmem:[#allocation8 + $0x2f0] sm:$0xff]  ;;  %v945_v40 = vld [vmem:[#allocation8 + $0x338] sm:$0xff] }
 0x1c4   :  { %2110 = vmatpush1.bf16.msra.mxu1 %v2109_v15  ;;  %v916_v15 = vld [vmem:[#allocation8 + $0x250] sm:$0xff]  ;;  %v2137_v35 = vpack.c.bf16 %v936_v34, %v932_v33  ;;  %v975_v33 = vld [vmem:[#allocation8 + $0x428] sm:$0xff]  ;;  %v973_v34 = vld [vmem:[#allocation8 + $0x418] sm:$0xff] }
 0x1c5   :  { %2112 = vmatprep.subr.bf16.mxu1 %v2111_v51  ;;  %v925_v51 = vld [vmem:[#allocation8 + $0x298] sm:$0xff]  ;;  %v2129_v55 = vpack.c.bf16 %v920_v49, %v916_v15  ;;  %v938_v15 = vld [vmem:[#allocation8 + $0x300] sm:$0xff] }
 0x1c6   :  { %1986 = vmatpush1.bf16.msra.mxu0 %v1985_v58  ;;  %v926_v58 = vld [vmem:[#allocation8 + $0x2a0] sm:$0xff] }
 0x1c7   :  { %1988 = vmatprep.subr.bf16.mxu0 %v1987_v59  ;;  %v924_v59 = vld [vmem:[#allocation8 + $0x290] sm:$0xff]  ;;  %v2005_v41 = vpack.c.bf16 %v926_v58, %v922_v57  ;;  %v953_v58 = vld [vmem:[#allocation8 + $0x378] sm:$0xff] }
 0x1c8   :  { %2114 = vmatpush1.bf16.msra.mxu1 %v2113_v52  ;;  %v2131_v52 = vpack.c.bf16 %v929_v53, %v925_v51  ;;  %v2133_v61 = vpack.c.bf16 %v928_v60, %v924_v59  ;;  %v944_v51 = vld [vmem:[#allocation8 + $0x330] sm:$0xff]  ;;  %v950_v59 = vld [vmem:[#allocation8 + $0x360] sm:$0xff] }
 0x1c9   :  { %2116 = vmatprep.subr.bf16.mxu1 %v2115_v62  ;;  %v2141_v53 = vpack.c.bf16 %v944_v51, %v940_v50  ;;  %v812_v50 = vld [vmem:[%s2830_s5] sm:$0xf] }
 0x1ca   :  { %1990 = vmatpush1.bf16.msra.mxu0 %v1989_v3 }
 0x1cb   :  { %1992 = vmatprep.subr.bf16.mxu0 %v1991_v45 }
 0x1cc   :  { %2118 = vmatpush1.bf16.msra.mxu1 %v2117_v44 }
 0x1cd   :  { %2120 = vmatprep.subr.bf16.mxu1 %v2119_v8 }
 0x1ce   :  { %1994 = vmatpush1.bf16.msra.mxu0 %v1993_v17 }
 0x1cf   :  { %1996 = vmatprep.subr.bf16.mxu0 %v1995_v23  ;;  %v933_v23 = vld [vmem:[#allocation8 + $0x2d8] sm:$0xff] }
 0x1d0   :  { %2122 = vmatpush1.bf16.msra.mxu1 %v2121_v18  ;;  %v935_v18 = vld [vmem:[#allocation8 + $0x2e8] sm:$0xff]  ;;  %v2135_v30 = vpack.c.bf16 %v937_v26, %v933_v23  ;;  %v964_v26 = vld [vmem:[#allocation8 + $0x3d0] sm:$0xff] }
 0x1d1   :  { %2124 = vmatprep.subr.bf16.mxu1 %v2123_v29  ;;  %v934_v29 = vld [vmem:[#allocation8 + $0x2e0] sm:$0xff] }
 0x1d2   :  { %1998 = vmatpush1.bf16.msra.mxu0 %v1997_v36  ;;  %v2009_v32 = vpack.c.bf16 %v934_v29, %v930_v27  ;;  %v939_v36 = vld [vmem:[#allocation8 + $0x308] sm:$0xff]  ;;  %v968_v27 = vld [vmem:[#allocation8 + $0x3f0] sm:$0xff] }
 0x1d3   :  { %2000 = vmatprep.subr.bf16.mxu0 %v1999_v38  ;;  %v941_v38 = vld [vmem:[#allocation8 + $0x318] sm:$0xff] }
 0x1d4   :  { %2126 = vmatpush1.bf16.msra.mxu1 %v2125_v37  ;;  %v943_v37 = vld [vmem:[#allocation8 + $0x328] sm:$0xff]  ;;  %v2139_v49 = vpack.c.bf16 %v945_v40, %v941_v38 }
 0x1d5   :  { %2128 = vmatprep.subr.bf16.mxu1 %v2127_v48  ;;  %v2011_v39 = vpack.c.bf16 %v943_v37, %v939_v36  ;;  %v942_v48 = vld [vmem:[#allocation8 + $0x320] sm:$0xff]  ;;  %v977_v36 = vld [vmem:[#allocation8 + $0x438] sm:$0xff] }
 0x1d6   :  { %2002 = vmatpush1.bf16.msra.mxu0 %v2001_v54  ;;  %v2013_v16 = vpack.c.bf16 %v942_v48, %v938_v15  ;;  %v947_v54 = vld [vmem:[#allocation8 + $0x348] sm:$0xff]  ;;  %v2155_v37 = vpack.c.bf16 %v977_v36, %v973_v34  ;;  %v993_v34 = vld [vmem:[#allocation8 + $0x4b8] sm:$0xff] }
 0x1d7   :  { %2004 = vmatprep.subr.bf16.mxu0 %v2003_v56  ;;  %v949_v56 = vld [vmem:[#allocation8 + $0x358] sm:$0xff] }
 0x1d8   :  { %2130 = vmatpush1.bf16.msra.mxu1 %v2129_v55  ;;  %v951_v55 = vld [vmem:[#allocation8 + $0x368] sm:$0xff]  ;;  %v2143_v60 = vpack.c.bf16 %v953_v58, %v949_v56  ;;  %v821_v56 = vrot.slane %v812_v50, %v2676_v25 }
 0x1d9   :  { %2132 = vmatprep.subr.bf16.mxu1 %v2131_v52  ;;  %v2015_v57 = vpack.c.bf16 %v951_v55, %v947_v54  ;;  %v946_v52 = vld [vmem:[#allocation8 + $0x340] sm:$0xff] }
 0x1da   :  { %2006 = vmatpush1.bf16.msra.mxu0 %v2005_v41  ;;  %v2017_v41 = vpack.c.bf16 %v950_v59, %v946_v52  ;;  %v817_v59 = vrot.slane %v812_v50, %v2672_v20 }
 0x1dc   :  { %2134 = vmatpush1.bf16.msra.mxu1 %v2133_v61  ;;  %v948_v61 = vld [vmem:[#allocation8 + $0x350] sm:$0xff] }
 0x1dd   :  { %2136 = vmatprep.subr.bf16.mxu1 %v2135_v30  ;;  %v2153_v30 = vpack.c.bf16 %v968_v27, %v964_v26 }
 0x1e0   :  { %2138 = vmatpush1.bf16.msra.mxu1 %v2137_v35 }
 0x1e1   :  { %2140 = vmatprep.subr.bf16.mxu1 %v2139_v49 }
 0x1e4   :  { %2142 = vmatpush1.bf16.msra.mxu1 %v2141_v53 }
 0x1e5   :  { %2144 = vmatprep.subr.bf16.mxu1 %v2143_v60  ;;  %v974_v60 = vld [vmem:[#allocation8 + $0x420] sm:$0xff] }
 0x247   :  { %v733_v62 = vpop.xlane.xlu0 %732 }
 0x248   :  { %v740_v63 = vmul.f32 0.001953125, %v733_v62  ;;  %v952_v62 = vld [vmem:[#allocation8 + $0x370] sm:$0xff] }
 0x24a   :  { %v2717_v43 = vsub.f32 %v2691_v42, %v740_v63  ;;  %v2720_v0 = vsub.f32 %v2696_v7, %v740_v63  ;;  %v2723_v1 = vsub.f32 %v2694_v4, %v740_v63  ;;  %v2726_v3 = vsub.f32 %v2698_v9, %v740_v63  ;;  %v955_v63 = vld [vmem:[#allocation8 + $0x388] sm:$0xff] }
 0x24b   :  { %v738_v2 = vpop.xlane.xlu0 %737 }
 0x24c   :  { %v741_v44 = vmul.f32 0.001953125, %v738_v2  ;;  %v750_v45 = vmul.f32 %v2717_v43, %v2717_v43  ;;  %v751_v5 = vmul.f32 %v2720_v0, %v2720_v0  ;;  %v752_v42 = vmul.f32 %v2723_v1, %v2723_v1 }
 0x24d   :  { %v753_v47 = vmul.f32 %v2726_v3, %v2726_v3  ;;  %v2145_v2 = vpack.c.bf16 %v952_v62, %v948_v61  ;;  %v976_v61 = vld [vmem:[#allocation8 + $0x430] sm:$0xff] }
 0x24e   :  { %v2735_v7 = vsub.f32 %v2702_v12, %v741_v44  ;;  %v2738_v4 = vsub.f32 %v2707_v19, %v741_v44  ;;  %v758_v6 = vadd.f32 %v751_v5, %v750_v45  ;;  %v2741_v9 = vsub.f32 %v2704_v14, %v741_v44  ;;  %v957_v45 = vld [vmem:[#allocation8 + $0x398] sm:$0xff] }
 0x24f   :  { %v2746_v46 = vsub.f32 %v2709_v21, %v741_v44  ;;  %v931_v21 = vld [vmem:[#allocation8 + $0x2c8] sm:$0xff]  ;;  %v961_v5 = vld [vmem:[#allocation8 + $0x3b8] sm:$0xff]  ;;  %2146 = vmatpush1.bf16.msra.mxu1 %v2145_v2  ;;  %v825_v2 = vrot.slane %v812_v50, %v2674_v22 }
 0x250   :  { %v759_v8 = vadd.f32 %v758_v6, %v752_v42  ;;  %v754_v10 = vmul.f32 %v2735_v7, %v2735_v7  ;;  %v755_v12 = vmul.f32 %v2738_v4, %v2738_v4  ;;  %v756_v19 = vmul.f32 %v2741_v9, %v2741_v9  ;;  %v959_v44 = vld [vmem:[#allocation8 + $0x3a8] sm:$0xff] }
 0x251   :  { %v757_v14 = vmul.f32 %v2746_v46, %v2746_v46  ;;  %v2007_v24 = vpack.c.bf16 %v935_v18, %v931_v21  ;;  %v2019_v42 = vpack.c.bf16 %v959_v44, %v955_v63  ;;  %v2147_v6 = vpack.c.bf16 %v961_v5, %v957_v45  ;;  %v969_v21 = vld [vmem:[#allocation8 + $0x3f8] sm:$0xff]  ;;  %v962_v18 = vld [vmem:[#allocation8 + $0x3c0] sm:$0xff]  ;;  %v979_v63 = vld [vmem:[#allocation8 + $0x448] sm:$0xff] }
 0x252   :  { %v760_v11 = vadd.f32 %v759_v8, %v753_v47  ;;  %v763_v13 = vadd.f32 %v755_v12, %v754_v10  ;;  %v954_v47 = vld [vmem:[#allocation8 + $0x380] sm:$0xff]  ;;  %v956_v10 = vld [vmem:[#allocation8 + $0x390] sm:$0xff]  ;;  %v983_v5 = vld [vmem:[#allocation8 + $0x468] sm:$0xff] }
 0x253   :  { %2008 = vmatprep.subr.bf16.mxu0 %v2007_v24  ;;  %v958_v8 = vld [vmem:[#allocation8 + $0x3a0] sm:$0xff]  ;;  %2148 = vmatprep.subr.bf16.mxu1 %v2147_v6  ;;  %v985_v6 = vld [vmem:[#allocation8 + $0x478] sm:$0xff] }
 0x254   :  { %761 = vadd.xlane.f32.xlu1 %v760_v11  ;;  %v764_v31 = vadd.f32 %v763_v13, %v756_v19  ;;  %2010 = vmatpush1.bf16.msra.mxu0 %v2009_v32  ;;  %v2021_v12 = vpack.c.bf16 %v958_v8, %v954_v47  ;;  %v960_v11 = vld [vmem:[#allocation8 + $0x3b0] sm:$0xff]  ;;  %v963_v19 = vld [vmem:[#allocation8 + $0x3c8] sm:$0xff]  ;;  %v966_v24 = vld [vmem:[#allocation8 + $0x3e0] sm:$0xff] }
 0x255   :  { %2012 = vmatprep.subr.bf16.mxu0 %v2011_v39  ;;  %v967_v13 = vld [vmem:[#allocation8 + $0x3e8] sm:$0xff]  ;;  %v2025_v29 = vpack.c.bf16 %v966_v24, %v962_v18  ;;  %v980_v18 = vld [vmem:[#allocation8 + $0x450] sm:$0xff] }
 0x256   :  { %v765_v17 = vadd.f32 %v764_v31, %v757_v14  ;;  %v2149_v14 = vpack.c.bf16 %v960_v11, %v956_v10  ;;  %v2023_v31 = vpack.c.bf16 %v967_v13, %v963_v19  ;;  %v971_v32 = vld [vmem:[#allocation8 + $0x408] sm:$0xff] }
 0x257   :  { %v2027_v35 = vpack.c.bf16 %v975_v33, %v971_v32  ;;  %v991_v32 = vld [vmem:[#allocation8 + $0x4a8] sm:$0xff]  ;;  %v989_v33 = vld [vmem:[#allocation8 + $0x498] sm:$0xff] }
 0x258   :  { %766 = vadd.xlane.f32.xlu1 %v765_v17  ;;  %2014 = vmatpush1.bf16.msra.mxu0 %v2013_v16  ;;  %v965_v17 = vld [vmem:[#allocation8 + $0x3d8] sm:$0xff]  ;;  %v782_v16 = vld [vmem:[%s2829_s4] sm:$0xf] }
 0x259   :  { %2016 = vmatprep.subr.bf16.mxu0 %v2015_v57  ;;  %v2151_v23 = vpack.c.bf16 %v969_v21, %v965_v17  ;;  %2150 = vmatpush1.bf16.msra.mxu1 %v2149_v14  ;;  %v791_v51 = vrot.slane %v782_v16, %v2676_v25  ;;  %v787_v53 = vrot.slane %v782_v16, %v2672_v20  ;;  %v970_v57 = vld [vmem:[#allocation8 + $0x400] sm:$0xff] }
 0x25a   :  { %v795_v54 = vrot.slane %v782_v16, %v2674_v22  ;;  %v978_v14 = vld [vmem:[#allocation8 + $0x440] sm:$0xff]  ;;  %v2031_v17 = vpack.c.bf16 %v983_v5, %v979_v63  ;;  %v1007_v63 = vld [vmem:[#allocation8 + $0x528] sm:$0xff] }
 0x25b   :  { %2152 = vmatprep.subr.bf16.mxu1 %v2151_v23  ;;  %v984_v23 = vld [vmem:[#allocation8 + $0x470] sm:$0xff] }
 0x25c   :  { %2018 = vmatpush1.bf16.msra.mxu0 %v2017_v41  ;;  %v972_v41 = vld [vmem:[#allocation8 + $0x410] sm:$0xff] }
 0x25d   :  { %2020 = vmatprep.subr.bf16.mxu0 %v2019_v42  ;;  %2154 = vmatpush1.bf16.msra.mxu1 %v2153_v30  ;;  %v981_v42 = vld [vmem:[#allocation8 + $0x458] sm:$0xff] }
 0x25e   :  { %2156 = vmatprep.subr.bf16.mxu1 %v2155_v37  ;;  %v2159_v21 = vpack.c.bf16 %v985_v6, %v981_v42  ;;  %v2161_v37 = vpack.c.bf16 %v984_v23, %v980_v18  ;;  %v1002_v42 = vld [vmem:[#allocation8 + $0x500] sm:$0xff] }
 0x25f   :  { %v1006_v6 = vld [vmem:[#allocation8 + $0x520] sm:$0xff] }
 0x260   :  { %2022 = vmatpush1.bf16.msra.mxu0 %v2021_v12  ;;  %v2775_v12 = vrot.slane %v782_v16, %v2678_v28 }
 0x261   :  { %2024 = vmatprep.subr.bf16.mxu0 %v2023_v31  ;;  %v982_v31 = vld [vmem:[#allocation8 + $0x460] sm:$0xff] }
 0x264   :  { %2026 = vmatpush1.bf16.msra.mxu0 %v2025_v29  ;;  %v987_v29 = vld [vmem:[#allocation8 + $0x488] sm:$0xff] }
 0x265   :  { %2028 = vmatprep.subr.bf16.mxu0 %v2027_v35  ;;  %v2035_v16 = vpack.c.bf16 %v991_v32, %v987_v29  ;;  %v1023_v29 = vld [vmem:[#allocation8 + $0x5a8] sm:$0xff] }
 0x2e1   :  { %v762_v38 = vpop.xlane.xlu1 %761 }
 0x2e2   :  { %v768_v39 = vmul.f32 0.001953125, %v762_v38  ;;  %v986_v38 = vld [vmem:[#allocation8 + $0x480] sm:$0xff] }
 0x2e4   :  { %v770_v40 = vadd.f32 1e-05, %v768_v39  ;;  %v990_v39 = vld [vmem:[#allocation8 + $0x4a0] sm:$0xff] }
 0x2e5   :  { %v767_v15 = vpop.xlane.xlu1 %766 }
 0x2e6   :  { %2345 = vrsqrt.f32 %v770_v40  ;;  %v769_v48 = vmul.f32 0.001953125, %v767_v15  ;;  %v988_v40 = vld [vmem:[#allocation8 + $0x490] sm:$0xff] }
 0x2e7   :  { %v992_v15 = vld [vmem:[#allocation8 + $0x4b0] sm:$0xff] }
 0x2e8   :  { %v771_v49 = vadd.f32 1e-05, %v769_v48  ;;  %v995_v48 = vld [vmem:[#allocation8 + $0x4c8] sm:$0xff] }
 0x2ea   :  { %2347 = vrsqrt.f32 %v771_v49 }
 0x2f0   :  { %v2346_v55 = vpop.eup %2345 }
 0x2f1   :  { %v775_v58 = vmul.f32 %v2346_v55, %v2720_v0  ;;  %v774_v52 = vmul.f32 %v2346_v55, %v2717_v43  ;;  %v776_v62 = vmul.f32 %v2346_v55, %v2723_v1  ;;  %v2029_v0 = vpack.c.bf16 %v974_v60, %v970_v57 }
 0x2f2   :  { %v2157_v43 = vpack.c.bf16 %v976_v61, %v972_v41  ;;  %v777_v10 = vmul.f32 %v2346_v55, %v2726_v3  ;;  %v2165_v57 = vpack.c.bf16 %v992_v15, %v988_v40  ;;  %v996_v41 = vld [vmem:[#allocation8 + $0x4d0] sm:$0xff]  ;;  %v1031_v40 = vld [vmem:[#allocation8 + $0x5e8] sm:$0xff]  ;;  %v1029_v15 = vld [vmem:[#allocation8 + $0x5d8] sm:$0xff] }
 0x2f3   :  { %v805_v44 = vmul.f32 %v791_v51, %v775_v58  ;;  %v804_v45 = vmul.f32 %v787_v53, %v774_v52  ;;  %v806_v47 = vmul.f32 %v795_v54, %v776_v62  ;;  %v994_v58 = vld [vmem:[#allocation8 + $0x4c0] sm:$0xff]  ;;  %v1000_v61 = vld [vmem:[#allocation8 + $0x4f0] sm:$0xff]  ;;  %v1003_v62 = vld [vmem:[#allocation8 + $0x508] sm:$0xff] }
 0x2f4   :  { %v2771_v8 = vpop.eup %2347  ;;  %v807_v30 = vmul.f32 %v2775_v12, %v777_v10  ;;  %v998_v52 = vld [vmem:[#allocation8 + $0x4e0] sm:$0xff]  ;;  %v2169_v5 = vpack.c.bf16 %v1000_v61, %v996_v41  ;;  %v1008_v10 = vld [vmem:[#allocation8 + $0x530] sm:$0xff] }
 0x2f5   :  { %v835_v11 = vadd.f32 %v821_v56, %v805_v44  ;;  %v834_v1 = vadd.f32 %v817_v59, %v804_v45  ;;  %v779_v19 = vmul.f32 %v2771_v8, %v2738_v4  ;;  %v778_v13 = vmul.f32 %v2771_v8, %v2735_v7  ;;  %v1009_v44 = vld [vmem:[#allocation8 + $0x538] sm:$0xff] }
 0x2f6   :  { %v2781_v24 = vadd.f32 %v825_v2, %v806_v47  ;;  %v780_v3 = vmul.f32 %v2771_v8, %v2741_v9  ;;  %v2786_v4 = vrot.slane %v812_v50, %v2678_v28  ;;  %v2033_v7 = vpack.c.bf16 %v982_v31, %v978_v14 }
 0x2f7   :  { %1184 = vmatprep.mubr.f32.mxu0 %v835_v11  ;;  %1338 = vmatprep.mubr.f32.mxu1 %v835_v11  ;;  %v809_v26 = vmul.f32 %v791_v51, %v779_v19  ;;  %v808_v27 = vmul.f32 %v787_v53, %v778_v13  ;;  %v2163_v50 = vpack.c.bf16 %v993_v34, %v989_v33  ;;  %v999_v51 = vld [vmem:[#allocation8 + $0x4e8] sm:$0xff]  ;;  %v997_v53 = vld [vmem:[#allocation8 + $0x4d8] sm:$0xff]  ;;  %v1018_v34 = vld [vmem:[#allocation8 + $0x580] sm:$0xff] }
 0x2f8   :  { %1185 = vmatmul.mubr.f32.vlgmr.msra.gmra.mrb[8].mxu0 %v834_v1  ;;  %1339 = vmatmul.mubr.f32.vlgmr.msra.gmra.mrb[8].mxu1 %v834_v1  ;;  %v810_v35 = vmul.f32 %v795_v54, %v780_v3  ;;  %v1001_v54 = vld [vmem:[#allocation8 + $0x4f8] sm:$0xff]  ;;  %v837_v55 = vadd.f32 %v2786_v4, %v807_v30  ;;  %v2041_v45 = vpack.c.bf16 %v998_v52, %v994_v58  ;;  %v1011_v11 = vld [vmem:[#allocation8 + $0x548] sm:$0xff]  ;;  %v1012_v3 = vld [vmem:[#allocation8 + $0x550] sm:$0xff] }
 0x2f9   :  { %2030 = vmatpush1.bf16.msra.mxu0 %v2029_v0  ;;  %2158 = vmatpush1.bf16.msra.mxu1 %v2157_v43  ;;  %v839_v9 = vadd.f32 %v821_v56, %v809_v26  ;;  %v838_v36 = vadd.f32 %v817_v59, %v808_v27  ;;  %v2037_v56 = vpack.c.bf16 %v990_v39, %v986_v38  ;;  %v1004_v43 = vld [vmem:[#allocation8 + $0x510] sm:$0xff]  ;;  %v1015_v1 = vld [vmem:[#allocation8 + $0x568] sm:$0xff]  ;;  %v1013_v19 = vld [vmem:[#allocation8 + $0x558] sm:$0xff] }
 0x2fa   :  { %2032 = vmatprep.subr.bf16.mxu0 %v2031_v17  ;;  %2160 = vmatprep.subr.bf16.mxu1 %v2159_v21  ;;  %v2789_v49 = vadd.f32 %v825_v2, %v810_v35  ;;  %v2039_v59 = vpack.c.bf16 %v999_v51, %v995_v48  ;;  %v2167_v60 = vpack.c.bf16 %v1001_v54, %v997_v53  ;;  %v1005_v2 = vld [vmem:[#allocation8 + $0x518] sm:$0xff]  ;;  %v1010_v17 = vld [vmem:[#allocation8 + $0x540] sm:$0xff]  ;;  %v1016_v26 = vld [vmem:[#allocation8 + $0x570] sm:$0xff] }
 0x2fb   :  { %1190 = vmatprep.mubr.f32.mxu0 %v839_v9  ;;  %1344 = vmatprep.mubr.f32.mxu1 %v839_v9  ;;  %v2043_v47 = vpack.c.bf16 %v1007_v63, %v1003_v62  ;;  %v2171_v0 = vpack.c.bf16 %v1009_v44, %v1005_v2  ;;  %v1017_v13 = vld [vmem:[#allocation8 + $0x578] sm:$0xff]  ;;  %v2045_v14 = vpack.c.bf16 %v1006_v6, %v1002_v42  ;;  %v1014_v21 = vld [vmem:[#allocation8 + $0x560] sm:$0xff]  ;;  %v1019_v27 = vld [vmem:[#allocation8 + $0x588] sm:$0xff] }
 0x2fc   :  { %1191 = vmatmul.mubr.f32.gmra.mrb[10].mxu0 %v838_v36  ;;  %1345 = vmatmul.mubr.f32.gmra.mrb[10].mxu1 %v838_v36  ;;  %v2173_v31 = vpack.c.bf16 %v1008_v10, %v1004_v43  ;;  %v2047_v18 = vpack.c.bf16 %v1015_v1, %v1011_v11  ;;  %v2175_v23 = vpack.c.bf16 %v1017_v13, %v1013_v19  ;;  %v1025_v30 = vld [vmem:[#allocation8 + $0x5b8] sm:$0xff]  ;;  %v1022_v35 = vld [vmem:[#allocation8 + $0x5a0] sm:$0xff]  ;;  %v1024_v38 = vld [vmem:[#allocation8 + $0x5b0] sm:$0xff] }
 0x2fd   :  { %2034 = vmatpush1.bf16.msra.mxu0 %v2033_v7  ;;  %2162 = vmatpush1.bf16.msra.mxu1 %v2161_v37  ;;  %v1021_v7 = vld [vmem:[#allocation8 + $0x598] sm:$0xff]  ;;  %v2049_v32 = vpack.c.bf16 %v1014_v21, %v1010_v17  ;;  %v2177_v33 = vpack.c.bf16 %v1016_v26, %v1012_v3  ;;  %v2051_v9 = vpack.c.bf16 %v1023_v29, %v1019_v27  ;;  %v1020_v37 = vld [vmem:[#allocation8 + $0x590] sm:$0xff]  ;;  %v1027_v39 = vld [vmem:[#allocation8 + $0x5c8] sm:$0xff] }
 0x2fe   :  { %1261 = vmatprep.mubr.f32.mxu0 %v837_v55  ;;  %1415 = vmatprep.mubr.f32.mxu1 %v837_v55  ;;  %v2179_v36 = vpack.c.bf16 %v1025_v30, %v1021_v7  ;;  %v1033_v48 = vld [vmem:[#allocation8 + $0x5f8] sm:$0xff]  ;;  %v1026_v51 = vld [vmem:[#allocation8 + $0x5c0] sm:$0xff]  ;;  %v2055_v54 = vpack.c.bf16 %v1031_v40, %v1027_v39  ;;  %v1035_v58 = vld [vmem:[#allocation8 + $0x608] sm:$0xff] }
 0x2ff   :  { %2036 = vmatprep.subr.bf16.mxu0 %v2035_v16  ;;  %2164 = vmatprep.subr.bf16.mxu1 %v2163_v50  ;;  %v2053_v16 = vpack.c.bf16 %v1022_v35, %v1018_v34  ;;  %v2181_v50 = vpack.c.bf16 %v1024_v38, %v1020_v37  ;;  %v1030_v53 = vld [vmem:[#allocation8 + $0x5e0] sm:$0xff]  ;;  %v2183_v55 = vpack.c.bf16 %v1033_v48, %v1029_v15  ;;  %v1039_v52 = vld [vmem:[#allocation8 + $0x628] sm:$0xff] }
 0x300   :  { %v2057_v41 = vpack.c.bf16 %v1030_v53, %v1026_v51  ;;  %v1034_v62 = vld [vmem:[#allocation8 + $0x600] sm:$0xff]  ;;  %v2059_v2 = vpack.c.bf16 %v1039_v52, %v1035_v58  ;;  %v1043_v42 = vld [vmem:[#allocation8 + $0x648] sm:$0xff] }
 0x301   :  { %2038 = vmatpush1.bf16.msra.mxu0 %v2037_v56  ;;  %2166 = vmatpush1.bf16.msra.mxu1 %v2165_v57  ;;  %v1028_v56 = vld [vmem:[#allocation8 + $0x5d0] sm:$0xff]  ;;  %v1038_v63 = vld [vmem:[#allocation8 + $0x620] sm:$0xff]  ;;  %v1047_v6 = vld [vmem:[#allocation8 + $0x668] sm:$0xff] }
 0x302   :  { %2040 = vmatprep.subr.bf16.mxu0 %v2039_v59  ;;  %2168 = vmatprep.subr.bf16.mxu1 %v2167_v60  ;;  %v1032_v57 = vld [vmem:[#allocation8 + $0x5f0] sm:$0xff]  ;;  %v1037_v59 = vld [vmem:[#allocation8 + $0x618] sm:$0xff]  ;;  %v2061_v43 = vpack.c.bf16 %v1038_v63, %v1034_v62  ;;  %v1042_v11 = vld [vmem:[#allocation8 + $0x640] sm:$0xff]  ;;  %v2063_v19 = vpack.c.bf16 %v1047_v6, %v1043_v42 }
 0x303   :  { %v1041_v60 = vld [vmem:[#allocation8 + $0x638] sm:$0xff]  ;;  %v2185_v61 = vpack.c.bf16 %v1032_v57, %v1028_v56  ;;  %v1046_v1 = vld [vmem:[#allocation8 + $0x660] sm:$0xff]  ;;  %v1051_v17 = vld [vmem:[#allocation8 + $0x688] sm:$0xff] }
 0x304   :  { %v2187_v44 = vpack.c.bf16 %v1041_v60, %v1037_v59  ;;  %v1055_v21 = vld [vmem:[#allocation8 + $0x6a8] sm:$0xff]  ;;  %v2065_v3 = vpack.c.bf16 %v1046_v1, %v1042_v11  ;;  %v1050_v27 = vld [vmem:[#allocation8 + $0x680] sm:$0xff] }
 0x305   :  { %2042 = vmatpush1.bf16.msra.mxu0 %v2041_v45  ;;  %2170 = vmatpush1.bf16.msra.mxu1 %v2169_v5  ;;  %v1036_v45 = vld [vmem:[#allocation8 + $0x610] sm:$0xff]  ;;  %v1054_v29 = vld [vmem:[#allocation8 + $0x6a0] sm:$0xff]  ;;  %v2067_v7 = vpack.c.bf16 %v1055_v21, %v1051_v17  ;;  %v1059_v34 = vld [vmem:[#allocation8 + $0x6c8] sm:$0xff] }
 0x306   :  { %2044 = vmatprep.subr.bf16.mxu0 %v2043_v47  ;;  %2172 = vmatprep.subr.bf16.mxu1 %v2171_v0  ;;  %v1040_v5 = vld [vmem:[#allocation8 + $0x630] sm:$0xff]  ;;  %v1045_v47 = vld [vmem:[#allocation8 + $0x658] sm:$0xff]  ;;  %v1063_v35 = vld [vmem:[#allocation8 + $0x6e8] sm:$0xff]  ;;  %v2069_v37 = vpack.c.bf16 %v1054_v29, %v1050_v27 }
 0x307   :  { %v1049_v0 = vld [vmem:[#allocation8 + $0x678] sm:$0xff]  ;;  %v2189_v10 = vpack.c.bf16 %v1040_v5, %v1036_v45  ;;  %v1058_v39 = vld [vmem:[#allocation8 + $0x6c0] sm:$0xff]  ;;  %v2071_v15 = vpack.c.bf16 %v1063_v35, %v1059_v34  ;;  %v1067_v51 = vld [vmem:[#allocation8 + $0x708] sm:$0xff] }
 0x308   :  { %v2191_v13 = vpack.c.bf16 %v1049_v0, %v1045_v47  ;;  %v1062_v40 = vld [vmem:[#allocation8 + $0x6e0] sm:$0xff]  ;;  %v1071_v53 = vld [vmem:[#allocation8 + $0x728] sm:$0xff] }
 0x309   :  { %2046 = vmatpush1.bf16.msra.mxu0 %v2045_v14  ;;  %2174 = vmatpush1.bf16.msra.mxu1 %v2173_v31  ;;  %v1044_v14 = vld [vmem:[#allocation8 + $0x650] sm:$0xff]  ;;  %v2073_v56 = vpack.c.bf16 %v1062_v40, %v1058_v39  ;;  %v1066_v58 = vld [vmem:[#allocation8 + $0x700] sm:$0xff]  ;;  %v2075_v59 = vpack.c.bf16 %v1071_v53, %v1067_v51  ;;  %v1075_v62 = vld [vmem:[#allocation8 + $0x748] sm:$0xff]  ;;  %v781_v40 = vmul.f32 %v2771_v8, %v2746_v46 }
 0x30a   :  { %2048 = vmatprep.subr.bf16.mxu0 %v2047_v18  ;;  %2176 = vmatprep.subr.bf16.mxu1 %v2175_v23  ;;  %v1048_v31 = vld [vmem:[#allocation8 + $0x670] sm:$0xff]  ;;  %v1053_v18 = vld [vmem:[#allocation8 + $0x698] sm:$0xff]  ;;  %v1070_v52 = vld [vmem:[#allocation8 + $0x720] sm:$0xff] }
 0x30b   :  { %v1057_v23 = vld [vmem:[#allocation8 + $0x6b8] sm:$0xff]  ;;  %v2193_v26 = vpack.c.bf16 %v1048_v31, %v1044_v14  ;;  %v1079_v63 = vld [vmem:[#allocation8 + $0x768] sm:$0xff]  ;;  %v2077_v45 = vpack.c.bf16 %v1070_v52, %v1066_v58  ;;  %v1074_v42 = vld [vmem:[#allocation8 + $0x740] sm:$0xff] }
 0x30c   :  { %v2195_v30 = vpack.c.bf16 %v1057_v23, %v1053_v18  ;;  %v1078_v6 = vld [vmem:[#allocation8 + $0x760] sm:$0xff]  ;;  %v2079_v47 = vpack.c.bf16 %v1079_v63, %v1075_v62  ;;  %v1083_v11 = vld [vmem:[#allocation8 + $0x788] sm:$0xff]  ;;  %v1486_v46 = vld [vmem:[#allocation10 + $0x190] sm:$0xff] }
 0x30d   :  { %2050 = vmatpush1.bf16.msra.mxu0 %v2049_v32  ;;  %2178 = vmatpush1.bf16.msra.mxu1 %v2177_v33  ;;  %v1052_v32 = vld [vmem:[#allocation8 + $0x690] sm:$0xff]  ;;  %v1087_v1 = vld [vmem:[#allocation8 + $0x7a8] sm:$0xff]  ;;  %v2081_v14 = vpack.c.bf16 %v1078_v6, %v1074_v42  ;;  %v1082_v17 = vld [vmem:[#allocation8 + $0x780] sm:$0xff] }
 0x30e   :  { %2052 = vmatprep.subr.bf16.mxu0 %v2051_v9  ;;  %2180 = vmatprep.subr.bf16.mxu1 %v2179_v36  ;;  %v1056_v33 = vld [vmem:[#allocation8 + $0x6b0] sm:$0xff]  ;;  %v1061_v9 = vld [vmem:[#allocation8 + $0x6d8] sm:$0xff]  ;;  %v1086_v21 = vld [vmem:[#allocation8 + $0x7a0] sm:$0xff]  ;;  %v2083_v18 = vpack.c.bf16 %v1087_v1, %v1083_v11 }
 0x30f   :  { %v1065_v36 = vld [vmem:[#allocation8 + $0x6f8] sm:$0xff]  ;;  %v2197_v38 = vpack.c.bf16 %v1056_v33, %v1052_v32  ;;  %v1091_v27 = vld [vmem:[#allocation8 + $0x7c8] sm:$0xff]  ;;  %v2085_v32 = vpack.c.bf16 %v1086_v21, %v1082_v17  ;;  %v1090_v34 = vld [vmem:[#allocation8 + $0x7c0] sm:$0xff] }
 0x310   :  { %v2199_v48 = vpack.c.bf16 %v1065_v36, %v1061_v9  ;;  %v1095_v29 = vld [vmem:[#allocation8 + $0x7e8] sm:$0xff]  ;;  %v1094_v35 = vld [vmem:[#allocation8 + $0x7e0] sm:$0xff]  ;;  %v1487_v8 = vld [vmem:[#allocation10 + $0x198] sm:$0xff] }
 0x311   :  { %2054 = vmatpush1.bf16.msra.mxu0 %v2053_v16  ;;  %2182 = vmatpush1.bf16.msra.mxu1 %v2181_v50  ;;  %v1060_v16 = vld [vmem:[#allocation8 + $0x6d0] sm:$0xff]  ;;  %v2087_v9 = vpack.c.bf16 %v1095_v29, %v1091_v27  ;;  %v1452_v39 = vld [vmem:[#allocation10 + $0x80] sm:$0xff]  ;;  %v1469_v52 = vld [vmem:[#allocation10 + $0x108] sm:$0xff] }
 0x312   :  { %2056 = vmatprep.subr.bf16.mxu0 %v2055_v54  ;;  %2184 = vmatprep.subr.bf16.mxu1 %v2183_v55  ;;  %v1064_v50 = vld [vmem:[#allocation8 + $0x6f0] sm:$0xff]  ;;  %v1069_v54 = vld [vmem:[#allocation8 + $0x718] sm:$0xff]  ;;  %v1468_v58 = vld [vmem:[#allocation10 + $0x100] sm:$0xff] }
 0x313   :  { %v1073_v55 = vld [vmem:[#allocation8 + $0x738] sm:$0xff]  ;;  %v2201_v57 = vpack.c.bf16 %v1064_v50, %v1060_v16  ;;  %v1485_v16 = vld [vmem:[#allocation10 + $0x188] sm:$0xff]  ;;  %v2089_v50 = vpack.c.bf16 %v1094_v35, %v1090_v34  ;;  %v1438_v62 = vld [vmem:[#allocation10 + $0x10] sm:$0xff] }
 0x314   :  { %v2203_v60 = vpack.c.bf16 %v1073_v55, %v1069_v54  ;;  %v1436_v55 = vld [vmem:[#allocation10] sm:$0xff]  ;;  %v1439_v63 = vld [vmem:[#allocation10 + $0x18] sm:$0xff]  ;;  %v1457_v6 = vld [vmem:[#allocation10 + $0xa8] sm:$0xff] }
 0x315   :  { %2058 = vmatpush1.bf16.msra.mxu0 %v2057_v41  ;;  %2186 = vmatpush1.bf16.msra.mxu1 %v2185_v61  ;;  %v1068_v41 = vld [vmem:[#allocation8 + $0x710] sm:$0xff]  ;;  %v1456_v42 = vld [vmem:[#allocation10 + $0xa0] sm:$0xff]  ;;  %v1491_v21 = vld [vmem:[#allocation10 + $0x1b8] sm:$0xff] }
 0x316   :  { %2060 = vmatprep.subr.bf16.mxu0 %v2059_v2  ;;  %2188 = vmatprep.subr.bf16.mxu1 %v2187_v44  ;;  %v1072_v61 = vld [vmem:[#allocation8 + $0x730] sm:$0xff]  ;;  %v1077_v2 = vld [vmem:[#allocation8 + $0x758] sm:$0xff]  ;;  %v1440_v11 = vld [vmem:[#allocation10 + $0x20] sm:$0xff]  ;;  %v2227_v1 = vpack.c.bf16 %v1457_v6, %v1456_v42 }
 0x317   :  { %v1081_v44 = vld [vmem:[#allocation8 + $0x778] sm:$0xff]  ;;  %v2205_v5 = vpack.c.bf16 %v1072_v61, %v1068_v41  ;;  %v2253_v61 = vpack.c.bf16 %v1469_v52, %v1468_v58  ;;  %v1490_v17 = vld [vmem:[#allocation10 + $0x1b0] sm:$0xff]  ;;  %v1492_v34 = vld [vmem:[#allocation10 + $0x1c0] sm:$0xff] }
 0x318   :  { %v2207_v0 = vpack.c.bf16 %v1081_v44, %v1077_v2  ;;  %v2263_v29 = vpack.c.bf16 %v1491_v21, %v1490_v17  ;;  %v1493_v35 = vld [vmem:[#allocation10 + $0x1c8] sm:$0xff]  ;;  %v1478_v52 = vld [vmem:[#allocation10 + $0x150] sm:$0xff]  ;;  %v1098_v17 = vld [vmem:[%s2832_s7] sm:$0xf] }
 0x319   :  { %2062 = vmatpush1.bf16.msra.mxu0 %v2061_v43  ;;  %2190 = vmatpush1.bf16.msra.mxu1 %v2189_v10  ;;  %v1076_v43 = vld [vmem:[#allocation8 + $0x750] sm:$0xff]  ;;  %v1481_v42 = vld [vmem:[#allocation10 + $0x168] sm:$0xff]  ;;  %v1103_v21 = vrot.slane %v1098_v17, %v2672_v20 }
 0x31a   :  { %2064 = vmatprep.subr.bf16.mxu0 %v2063_v19  ;;  %2192 = vmatprep.subr.bf16.mxu1 %v2191_v13  ;;  %v1080_v10 = vld [vmem:[#allocation8 + $0x770] sm:$0xff]  ;;  %v1085_v19 = vld [vmem:[#allocation8 + $0x798] sm:$0xff] }
 0x31b   :  { %v1089_v13 = vld [vmem:[#allocation8 + $0x7b8] sm:$0xff]  ;;  %v2209_v31 = vpack.c.bf16 %v1080_v10, %v1076_v43  ;;  %v2225_v43 = vpack.c.bf16 %v1439_v63, %v1438_v62 }
 0x31c   :  { %v2211_v23 = vpack.c.bf16 %v1089_v13, %v1085_v19  ;;  %v1472_v13 = vld [vmem:[#allocation10 + $0x120] sm:$0xff] }
 0x31d   :  { %2066 = vmatpush1.bf16.msra.mxu0 %v2065_v3  ;;  %2194 = vmatpush1.bf16.msra.mxu1 %v2193_v26  ;;  %v1084_v3 = vld [vmem:[#allocation8 + $0x790] sm:$0xff] }
 0x31e   :  { %2068 = vmatprep.subr.bf16.mxu0 %v2067_v7  ;;  %2196 = vmatprep.subr.bf16.mxu1 %v2195_v30  ;;  %v1088_v26 = vld [vmem:[#allocation8 + $0x7b0] sm:$0xff]  ;;  %v1093_v7 = vld [vmem:[#allocation8 + $0x7d8] sm:$0xff] }
 0x31f   :  { %v1097_v30 = vld [vmem:[#allocation8 + $0x7f8] sm:$0xff]  ;;  %v2213_v33 = vpack.c.bf16 %v1088_v26, %v1084_v3  ;;  %v1442_v3 = vld [vmem:[#allocation10 + $0x30] sm:$0xff] }
 0x320   :  { %v2215_v36 = vpack.c.bf16 %v1097_v30, %v1093_v7  ;;  %v1443_v26 = vld [vmem:[#allocation10 + $0x38] sm:$0xff]  ;;  %v1474_v7 = vld [vmem:[#allocation10 + $0x130] sm:$0xff] }
 0x321   :  { %2070 = vmatpush1.bf16.msra.mxu0 %v2069_v37  ;;  %2198 = vmatpush1.bf16.msra.mxu1 %v2197_v38  ;;  %v1092_v37 = vld [vmem:[#allocation8 + $0x7d0] sm:$0xff]  ;;  %v1475_v30 = vld [vmem:[#allocation10 + $0x138] sm:$0xff] }
 0x322   :  { %2072 = vmatprep.subr.bf16.mxu0 %v2071_v15  ;;  %2200 = vmatprep.subr.bf16.mxu1 %v2199_v48  ;;  %v1096_v38 = vld [vmem:[#allocation8 + $0x7f0] sm:$0xff]  ;;  %v1453_v15 = vld [vmem:[#allocation10 + $0x88] sm:$0xff]  ;;  %v1484_v48 = vld [vmem:[#allocation10 + $0x180] sm:$0xff] }
 0x323   :  { %v2217_v51 = vpack.c.bf16 %v1096_v38, %v1092_v37  ;;  %v2219_v53 = vpack.c.bf16 %v1453_v15, %v1452_v39  ;;  %v2251_v54 = vpack.c.bf16 %v1485_v16, %v1484_v48  ;;  %v1445_v37 = vld [vmem:[#allocation10 + $0x48] sm:$0xff]  ;;  %v2267_v39 = vpack.c.bf16 %v1493_v35, %v1492_v34  ;;  %v1462_v48 = vld [vmem:[#allocation10 + $0xd0] sm:$0xff]  ;;  %v1463_v16 = vld [vmem:[#allocation10 + $0xd8] sm:$0xff] }
 0x324   :  { %v1477_v15 = vld [vmem:[#allocation10 + $0x148] sm:$0xff] }
 0x325   :  { %2074 = vmatpush1.bf16.msra.mxu0 %v2073_v56  ;;  %2202 = vmatpush1.bf16.msra.mxu1 %v2201_v57  ;;  %v1437_v56 = vld [vmem:[#allocation10 + $0x8] sm:$0xff]  ;;  %v811_v57 = vmul.f32 %v2775_v12, %v781_v40  ;;  %v1471_v12 = vld [vmem:[#allocation10 + $0x118] sm:$0xff]  ;;  %v1476_v40 = vld [vmem:[#allocation10 + $0x140] sm:$0xff] }
 0x326   :  { %2076 = vmatprep.subr.bf16.mxu0 %v2075_v59  ;;  %2204 = vmatprep.subr.bf16.mxu1 %v2203_v60  ;;  %v1454_v59 = vld [vmem:[#allocation10 + $0x90] sm:$0xff]  ;;  %v1455_v60 = vld [vmem:[#allocation10 + $0x98] sm:$0xff]  ;;  %v2221_v41 = vpack.c.bf16 %v1437_v56, %v1436_v55 }
 0x327   :  { %v841_v2 = vadd.f32 %v2786_v4, %v811_v57  ;;  %v2223_v44 = vpack.c.bf16 %v1455_v60, %v1454_v59  ;;  %v1441_v4 = vld [vmem:[#allocation10 + $0x28] sm:$0xff]  ;;  %v1446_v55 = vld [vmem:[#allocation10 + $0x50] sm:$0xff]  ;;  %v1447_v56 = vld [vmem:[#allocation10 + $0x58] sm:$0xff]  ;;  %v2239_v57 = vpack.c.bf16 %v1463_v16, %v1462_v48 }
 0x328   :  { %v1479_v59 = vld [vmem:[#allocation10 + $0x158] sm:$0xff]  ;;  %v1464_v60 = vld [vmem:[#allocation10 + $0xe0] sm:$0xff] }
 0x329   :  { %2078 = vmatpush1.bf16.msra.mxu0 %v2077_v45  ;;  %2206 = vmatpush1.bf16.msra.mxu1 %v2205_v5  ;;  %v2255_v45 = vpack.c.bf16 %v1487_v8, %v1486_v46  ;;  %v1470_v5 = vld [vmem:[#allocation10 + $0x110] sm:$0xff]  ;;  %v1465_v46 = vld [vmem:[#allocation10 + $0xe8] sm:$0xff]  ;;  %v1496_v8 = vld [vmem:[#allocation10 + $0x1e0] sm:$0xff]  ;;  %v2273_v62 = vpack.c.bf16 %v1479_v59, %v1478_v52 }
 0x32a   :  { %2080 = vmatprep.subr.bf16.mxu0 %v2079_v47  ;;  %2208 = vmatprep.subr.bf16.mxu1 %v2207_v0  ;;  %v1488_v47 = vld [vmem:[#allocation10 + $0x1a0] sm:$0xff]  ;;  %v1489_v0 = vld [vmem:[#allocation10 + $0x1a8] sm:$0xff]  ;;  %v2257_v10 = vpack.c.bf16 %v1471_v12, %v1470_v5  ;;  %v2243_v63 = vpack.c.bf16 %v1465_v46, %v1464_v60 }
 0x32b   :  { %v2259_v19 = vpack.c.bf16 %v1489_v0, %v1488_v47  ;;  %v1480_v5 = vld [vmem:[#allocation10 + $0x160] sm:$0xff]  ;;  %v1466_v47 = vld [vmem:[#allocation10 + $0xf0] sm:$0xff]  ;;  %v1467_v0 = vld [vmem:[#allocation10 + $0xf8] sm:$0xff] }
 0x32c   :  { %v2277_v6 = vpack.c.bf16 %v1481_v42, %v1480_v5 }
 0x32d   :  { %2082 = vmatpush1.bf16.msra.mxu0 %v2081_v14  ;;  %2210 = vmatpush1.bf16.msra.mxu1 %v2209_v31  ;;  %v1473_v14 = vld [vmem:[#allocation10 + $0x128] sm:$0xff]  ;;  %v1458_v31 = vld [vmem:[#allocation10 + $0xb0] sm:$0xff] }
 0x32e   :  { %2084 = vmatprep.subr.bf16.mxu0 %v2083_v18  ;;  %2212 = vmatprep.subr.bf16.mxu1 %v2211_v23  ;;  %v2229_v18 = vpack.c.bf16 %v1441_v4, %v1440_v11  ;;  %v2261_v23 = vpack.c.bf16 %v1473_v14, %v1472_v13  ;;  %v1499_v11 = vld [vmem:[#allocation10 + $0x1f8] sm:$0xff]  ;;  %v1450_v4 = vld [vmem:[#allocation10 + $0x70] sm:$0xff] }
 0x32f   :  { %v1482_v14 = vld [vmem:[#allocation10 + $0x170] sm:$0xff] }
 0x331   :  { %2086 = vmatpush1.bf16.msra.mxu0 %v2085_v32  ;;  %2214 = vmatpush1.bf16.msra.mxu1 %v2213_v33  ;;  %v1460_v32 = vld [vmem:[#allocation10 + $0xc0] sm:$0xff]  ;;  %v1461_v33 = vld [vmem:[#allocation10 + $0xc8] sm:$0xff] }
 0x332   :  { %2088 = vmatprep.subr.bf16.mxu0 %v2087_v9  ;;  %2216 = vmatprep.subr.bf16.mxu1 %v2215_v36  ;;  %v2265_v9 = vpack.c.bf16 %v1475_v30, %v1474_v7  ;;  %v1444_v36 = vld [vmem:[#allocation10 + $0x40] sm:$0xff]  ;;  %v2235_v38 = vpack.c.bf16 %v1461_v33, %v1460_v32 }
 0x335   :  { %2090 = vmatpush1.bf16.msra.mxu0 %v2089_v50  ;;  %2218 = vmatpush1.bf16.msra.mxu1 %v2217_v51  ;;  %v1494_v50 = vld [vmem:[#allocation10 + $0x1d0] sm:$0xff]  ;;  %v1495_v51 = vld [vmem:[#allocation10 + $0x1d8] sm:$0xff] }
 0x336   :  { %2220 = vmatprep.subr.bf16.mxu0 %v2219_v53  ;;  %2252 = vmatprep.subr.bf16.mxu1 %v2251_v54  ;;  %v2237_v53 = vpack.c.bf16 %v1445_v37, %v1444_v36  ;;  %v2269_v54 = vpack.c.bf16 %v1477_v15, %v1476_v40  ;;  %v2271_v58 = vpack.c.bf16 %v1495_v51, %v1494_v50 }
 0x338   :  { %1262 = vmatmul.mubr.f32.vlgmr.msra.gmra.mrb[8].mxu0 %v2781_v24  ;;  %1416 = vmatmul.mubr.f32.vlgmr.msra.gmra.mrb[8].mxu1 %v2781_v24  ;;  %v1459_v24 = vld [vmem:[#allocation10 + $0xb8] sm:$0xff] }
 0x339   :  { %1267 = vmatprep.mubr.f32.mxu0 %v841_v2  ;;  %1421 = vmatprep.mubr.f32.mxu1 %v841_v2  ;;  %v2231_v27 = vpack.c.bf16 %v1459_v24, %v1458_v31  ;;  %v1483_v31 = vld [vmem:[#allocation10 + $0x178] sm:$0xff] }
 0x33a   :  { %2222 = vmatpush3.bf16.msra.mxu0 %v2221_v41  ;;  %2254 = vmatpush3.bf16.msra.mxu1 %v2253_v61  ;;  %v1497_v41 = vld [vmem:[#allocation10 + $0x1e8] sm:$0xff]  ;;  %v2241_v61 = vpack.c.bf16 %v1447_v56, %v1446_v55  ;;  %v2281_v24 = vpack.c.bf16 %v1483_v31, %v1482_v14 }
 0x33b   :  { %2224 = vmatprep.subr.bf16.mxu0 %v2223_v44  ;;  %2256 = vmatprep.subr.bf16.mxu1 %v2255_v45  ;;  %v2275_v2 = vpack.c.bf16 %v1497_v41, %v1496_v8  ;;  %v1448_v44 = vld [vmem:[#allocation10 + $0x60] sm:$0xff]  ;;  %v1449_v45 = vld [vmem:[#allocation10 + $0x68] sm:$0xff] }
 0x33c   :  { %1268 = vmatmul.mubr.f32.gmra.mrb[10].mxu0 %v2789_v49  ;;  %1422 = vmatmul.mubr.f32.gmra.mrb[10].mxu1 %v2789_v49  ;;  %v2233_v49 = vpack.c.bf16 %v1443_v26, %v1442_v3  ;;  %v2245_v12 = vpack.c.bf16 %v1449_v45, %v1448_v44  ;;  %v1115_v3 = vrot.slane %v1098_v17, %v2678_v28 }
 0x33e   :  { %2226 = vmatpush3.bf16.msra.mxu0 %v2225_v43  ;;  %2258 = vmatpush3.bf16.msra.mxu1 %v2257_v10  ;;  %v1498_v43 = vld [vmem:[#allocation10 + $0x1f0] sm:$0xff]  ;;  %v2247_v10 = vpack.c.bf16 %v1467_v0, %v1466_v47 }
 0x33f   :  { %2228 = vmatprep.subr.bf16.mxu0 %v2227_v1  ;;  %2260 = vmatprep.subr.bf16.mxu1 %v2259_v19  ;;  %v1451_v1 = vld [vmem:[#allocation10 + $0x78] sm:$0xff]  ;;  %v2279_v19 = vpack.c.bf16 %v1499_v11, %v1498_v43 }
 0x340   :  { %v2249_v13 = vpack.c.bf16 %v1451_v1, %v1450_v4 }
 0x342   :  { %2230 = vmatpush3.bf16.msra.mxu0 %v2229_v18  ;;  %2262 = vmatpush3.bf16.msra.mxu1 %v2261_v23  ;;  %v1111_v18 = vrot.slane %v1098_v17, %v2674_v22  ;;  %v1107_v23 = vrot.slane %v1098_v17, %v2676_v25 }
 0x343   :  { %2232 = vmatprep.subr.bf16.mxu0 %v2231_v27  ;;  %2264 = vmatprep.subr.bf16.mxu1 %v2263_v29 }
 0x346   :  { %2234 = vmatpush3.bf16.msra.mxu0 %v2233_v49  ;;  %2266 = vmatpush3.bf16.msra.mxu1 %v2265_v9 }
 0x347   :  { %2236 = vmatprep.subr.bf16.mxu0 %v2235_v38  ;;  %2268 = vmatprep.subr.bf16.mxu1 %v2267_v39 }
 0x34a   :  { %2238 = vmatpush3.bf16.msra.mxu0 %v2237_v53  ;;  %2270 = vmatpush3.bf16.msra.mxu1 %v2269_v54  ;;  %v1694_v54 = vld [vmem:[%s2834_s9] ss:$0 sm:$0xff]  ;;  %s2459_s9 = scalar_lea.vmem %s1665_s0, 256 }
 0x34b   :  { %2240 = vmatprep.subr.bf16.mxu0 %v2239_v57  ;;  %2272 = vmatprep.subr.bf16.mxu1 %v2271_v58  ;;  %p2460_p12 = scmp.ne.s32.totalorder %s1665_s0, %s2459_s9  ;;  %p2465_p0 = scmp.lt.s32.totalorder %s2459_s9, %s2459_s9 }
 0x34d   :  { %p2466_p1 = por %p2465_p0, %p2464_p13 }
 0x34e   :  { %2242 = vmatpush3.bf16.msra.mxu0 %v2241_v61  ;;  %2274 = vmatpush3.bf16.msra.mxu1 %v2273_v62 }
 0x34f   :  { %2244 = vmatprep.subr.bf16.mxu0 %v2243_v63  ;;  %2276 = vmatprep.subr.bf16.mxu1 %v2275_v2  ;;  %p2467_p2 = pnand %p2466_p1, %p2460_p12 }
 0x352   :  { %2246 = vmatpush3.bf16.msra.mxu0 %v2245_v12  ;;  %2278 = vmatpush3.bf16.msra.mxu1 %v2277_v6 }
 0x353   :  { %2248 = vmatprep.subr.bf16.mxu0 %v2247_v10  ;;  %2280 = vmatprep.subr.bf16.mxu1 %v2279_v19 }
 0x356   :  { %2250 = vmatpush3.bf16.msra.mxu0 %v2249_v13  ;;  %2282 = vmatpush3.bf16.msra.mxu1 %v2281_v24 }
 0x40b   :  { %v1263_v26 = vpop.f32.mrb[8].mxu0  ;;  %v1417_v27 = vpop.f32.mrb[8].mxu1 }
 0x40c   :  { %v2283_v29 = vadd.f32 %v1263_v26, %v1103_v21  ;;  %v2287_v7 = vadd.f32 %v1417_v27, %v1111_v18  ;;  %v1265_v30 = vpop.f32.mrb[9].mxu0  ;;  %v1419_v32 = vpop.f32.mrb[9].mxu1 }
 0x40d   :  { %v2284_v33 = vadd.f32 %v1265_v30, %v1107_v23  ;;  %v2288_v34 = vadd.f32 %v1419_v32, %v1115_v3 }
 0x40e   :  { %v1428_v37 = vmax.f32 %v2283_v29, 0.0  ;;  %v1430_v20 = vmax.f32 %v2287_v7, 0.0 }
 0x40f   :  { %v1429_v35 = vmax.f32 %v2284_v33, 0.0  ;;  %v1431_v49 = vmax.f32 %v2288_v34, 0.0  ;;  %v1269_v9 = vpop.f32.mrb[10].mxu0  ;;  %v1423_v36 = vpop.f32.mrb[10].mxu1 }
 0x410   :  { %v2285_v38 = vadd.f32 %v1269_v9, %v1103_v21  ;;  %v2289_v22 = vadd.f32 %v1423_v36, %v1111_v18  ;;  %v1271_v39 = vpop.f32.mrb[11].mxu0  ;;  %v1425_v25 = vpop.f32.mrb[11].mxu1 }
 0x411   :  { %v2286_v40 = vadd.f32 %v1271_v39, %v1107_v23  ;;  %v2290_v28 = vadd.f32 %v1425_v25, %v1115_v3  ;;  %1571 = vmatprep.mubr.f32.mxu0 %v1429_v35  ;;  %1646 = vmatprep.mubr.f32.mxu1 %v1431_v49 }
 0x412   :  { %1572 = vmatmul.mubr.f32.vlgmr.msra.gmra.mrb[12].mxu0 %v1428_v37  ;;  %1647 = vmatmul.mubr.f32.vlgmr.msra.gmra.mrb[12].mxu1 %v1430_v20  ;;  %v1432_v16 = vmax.f32 %v2285_v38, 0.0  ;;  %v1434_v50 = vmax.f32 %v2289_v22, 0.0 }
 0x413   :  { %v1433_v15 = vmax.f32 %v2286_v40, 0.0  ;;  %v1435_v48 = vmax.f32 %v2290_v28, 0.0 }
 0x415   :  { %1576 = vmatprep.mubr.f32.mxu0 %v1433_v15  ;;  %1651 = vmatprep.mubr.f32.mxu1 %v1435_v48 }
 0x416   :  { %1577 = vmatmul.mubr.f32.gmra.mrb[14].mxu0 %v1432_v16  ;;  %1652 = vmatmul.mubr.f32.gmra.mrb[14].mxu1 %v1434_v50 }
 0x4e5   :  { %v1727_v51 = vpop.f32.mrb[12].mxu0  ;;  %v1765_v53 = vpop.f32.mrb[12].mxu1 }
 0x4e6   :  { %v1728_v55 = vpop.f32.mrb[13].mxu0  ;;  %v1766_v56 = vpop.f32.mrb[13].mxu1 }
 0x4e7   :  { %v1729_v57 = vadd.f32 %v1728_v55, %v1727_v51  ;;  %v1767_v58 = vadd.f32 %v1766_v56, %v1765_v53 }
 0x4e9   :  { %v1574_v52 = vadd.f32 %v1729_v57, %v1694_v54  ;;  %v1730_v59 = vpop.f32.mrb[14].mxu0  ;;  %v1768_v60 = vpop.f32.mrb[14].mxu1 }
 0x4ea   :  { %v1731_v46 = vpop.f32.mrb[15].mxu0  ;;  %v1769_v8 = vpop.f32.mrb[15].mxu1 }
 0x4eb   :  { %v1649_v41 = vadd.f32 %v1767_v58, %v1574_v52  ;;  %v1732_v61 = vadd.f32 %v1731_v46, %v1730_v59  ;;  %v1770_v62 = vadd.f32 %v1769_v8, %v1768_v60 }
 0x4ed   :  { %1657 = vst [vmem:[#allocation11] sm:$0xff] %v1649_v41  ;;  %v1579_v63 = vadd.f32 %v1732_v61, %v1694_v54 }
 0x4ef   :  { %v1654_v2 = vadd.f32 %v1770_v62, %v1579_v63 }
 0x4f1   :  { %1658 = vst [vmem:[#allocation11 + $0x8] sm:$0xff] %v1654_v2 }
 0x4f2   :  { %2470 = shalt.err (!%p2467_p2)
}
 0x4f3   :  { %s2471_s22 = scalar_lea.hbm %s2835_s10, 256 }
 0x4f4   :  { %p2472_p3 = scmp.ne.s32.totalorder %s2835_s10, %s2471_s22  ;;  %p2475_p4 = scmp.lt.u32.totalorder %s2471_s22, %s2835_s10 }
 0x4f6   :  { %p2477_p5 = pnand %p2475_p4, %p2472_p3 }
 0x4f8   :  { %2480 = shalt.err (!%p2477_p5)
}
 0x4f9   :  { %1670 = dma.vmem_to_hbm [thread:$0]  %s1665_s0, 256, %s2835_s10, [#allocation4], %s2500_s2, %s2500_s2, %s2501_s13  }
 0x4fa   :  { %2487 = dma.done.wait [#allocation4], 256  }
 0x4fb   :  { %2488 = vsyncadd [#allocation4], 4294967040 }
 0x4fc   :  { %1674 = vsyncpa [#allocation3], 1 }
 0x4fd   :  { %1675 = vsyncpa [#allocation6], 1 }
 0x4fe   :  { %1676 = vsyncpa [#allocation9], 1 }
 0x4ff   :  { %1677 = vsyncpa [#allocation4], 1 }

</bundles_post_ra>
